<compile_context>
chip_gen: v7x
topology: tpu7x:2x2x1
jax: 0.10.0
libtpu: 0.0.40
codegen_flags: <defaults>
</compile_context>

<pallas_src>
import functools

import jax
import jax.numpy as jnp
from jax import lax
from jax.experimental import pallas as pl
from jax.experimental.pallas import tpu as pltpu


def _round_up(x, m):
    return (x + m - 1) // m * m


def _vmem_capacity_bytes():
    try:
        info = pltpu.get_tpu_info()
        cap = int(getattr(info, "vmem_capacity_bytes", 0))
        if cap > 0:
            return cap
    except Exception:
        pass
    return 64 << 20        # conservative (v7x-sized) fallback


def _pick_tile_i(intermediate, desired):
    """Largest multiple of 128 <= desired that divides `intermediate`."""
    if intermediate % 128 != 0 or intermediate <= desired:
        return intermediate
    t = (min(desired, intermediate) // 128) * 128
    while t > 128 and intermediate % t != 0:
        t -= 128
    return t if intermediate % t == 0 else intermediate


def _vmem_need(tile_m, tile_i, hidden, act_bytes, w_bytes):
    """Double-buffered tiles + resident accumulator + f32 intermediates."""
    return (2 * tile_m * hidden * act_bytes            # x tiles
            + 2 * hidden * 2 * tile_i * w_bytes        # fused gate|up tiles
            + 2 * tile_i * hidden * w_bytes            # down-proj tiles
            + 2 * tile_m * hidden * act_bytes          # out tiles
            + 2 * tile_m * 4                           # routing-weight tiles
            + tile_m * hidden * 4                      # f32 accumulator scratch
            + 4 * tile_m * tile_i * 4)                 # gu/h f32 intermediates


# --------------------------------------------------------------------------
# Grouped SwiGLU expert kernel
# --------------------------------------------------------------------------
def _grouped_swiglu_kernel(tile_expert_ref, tile_valid_ref,
                           x_ref, rw_ref, wgu_ref, wd_ref, o_ref,
                           acc_ref, *, tile_i):
    """One m-tile of tokens (all from one expert) x one intermediate tile.

    grid = (num_m_tiles, n_k): axis 0 parallel over token tiles, axis 1 is the
    reduction over the intermediate dimension of the down projection.
    """
    m = pl.program_id(0)
    k = pl.program_id(1)
    valid = tile_valid_ref[m] > 0

    @pl.when(jnp.logical_and(valid, k == 0))
    def _():
        acc_ref[...] = jnp.zeros_like(acc_ref)

    @pl.when(valid)
    def _():
        x = x_ref[...]                                       # (tile_m, hidden)
        # Fused gate/up: wgu block = [Wg_tile | Wu_tile] along the lane axis.
        gu = jnp.dot(x, wgu_ref[...], preferred_element_type=jnp.float32)
        g = gu[:, :tile_i]
        u = gu[:, tile_i:]
        h = (g * jax.nn.sigmoid(g)) * u                      # SiLU(gate)*up, f32
        acc_ref[...] += jnp.dot(h.astype(wd_ref.dtype), wd_ref[...],
                                preferred_element_type=jnp.float32)

    @pl.when(jnp.logical_and(valid, k == pl.num_programs(1) - 1))
    def _():
        # Fused combine scale: multiply by the routing weight in the epilogue.
        o_ref[...] = (acc_ref[...] * rw_ref[...]).astype(o_ref.dtype)


def grouped_swiglu(x_pad, rw_pad, tile_expert, tile_valid, wgu, w_down, *,
                   tile_m, tile_i, vmem_budget):
    """x_pad: [P, H] rows grouped by expert (each group padded to tile_m).
    rw_pad: [P, 1] f32 routing weights (0 for padding rows).
    tile_expert / tile_valid: int32 [P // tile_m] scalar-prefetched maps.
    wgu: [E, H, 2*I] interleaved gate/up weights; w_down: [E, I, H].
    Returns [P, H] (already scaled by routing weights)."""
    P, hidden = x_pad.shape
    n_exp, _, two_i = wgu.shape
    intermediate = two_i // 2
    assert P % tile_m == 0
    assert intermediate % tile_i == 0
    num_m_tiles = P // tile_m
    n_k = intermediate // tile_i

    bpe = jnp.dtype(x_pad.dtype).itemsize
    wpe = jnp.dtype(wgu.dtype).itemsize

    need = _vmem_need(tile_m, tile_i, hidden, bpe, wpe)
    vmem_limit = int(min(max(need + (8 << 20), 32 << 20), vmem_budget))

    # Advisory cost estimate for the surrounding XLA schedule.
    flops = 6 * tile_m * hidden * tile_i * num_m_tiles * n_k
    transcendentals = tile_m * tile_i * num_m_tiles * n_k
    bytes_accessed = (num_m_tiles * n_k *
                      (hidden * 2 * tile_i * wpe + tile_i * hidden * wpe)
                      + 2 * P * hidden * bpe)

    grid_spec = pltpu.PrefetchScalarGridSpec(
        num_scalar_prefetch=2,
        grid=(num_m_tiles, n_k),
        in_specs=[
            # Activations; dead tiles collapse onto block 0 (no extra DMA).
            pl.BlockSpec((tile_m, hidden), lambda m, k, te, tv: (m * tv[m], 0)),
            # Per-row routing weights (f32).
            pl.BlockSpec((tile_m, 1), lambda m, k, te, tv: (m * tv[m], 0)),
            # Fused [gate|up] weight tile; dead tiles collapse onto k-block 0.
            pl.BlockSpec((None, hidden, 2 * tile_i),
                         lambda m, k, te, tv: (te[m], 0, k * tv[m])),
            # Down-projection weight tile.
            pl.BlockSpec((None, tile_i, hidden),
                         lambda m, k, te, tv: (te[m], k * tv[m], 0)),
        ],
        out_specs=pl.BlockSpec((tile_m, hidden), lambda m, k, te, tv: (m, 0)),
        scratch_shapes=[pltpu.VMEM((tile_m, hidden), jnp.float32)],
    )

    return pl.pallas_call(
        functools.partial(_grouped_swiglu_kernel, tile_i=tile_i),
        out_shape=jax.ShapeDtypeStruct((P, hidden), x_pad.dtype),
        grid_spec=grid_spec,
        compiler_params=pltpu.CompilerParams(
            dimension_semantics=("parallel", "arbitrary"),
            vmem_limit_bytes=vmem_limit,
        ),
        cost_estimate=pl.CostEstimate(flops=flops,
                                      transcendentals=transcendentals,
                                      bytes_accessed=bytes_accessed),
    )(tile_expert, tile_valid, x_pad, rw_pad, wgu, w_down)


# --------------------------------------------------------------------------
# SparseMoEBlock forward (router + dispatch + grouped kernel + combine + aux)
# --------------------------------------------------------------------------
def sparse_moe_block_forward(x, router_w, w_gate, w_up, w_down, *,
                             num_experts_per_tok=2, tile_m=None, tile_i=None,
                             router_aux_loss_coef=0.01, router_z_loss_coef=0.001):
    """x: [B, S, H]; router_w: [E, H]; w_gate/w_up: [E, H, I]; w_down: [E, I, H]."""
    B, S, H = x.shape
    E, _, I = w_gate.shape
    T = B * S
    k = num_experts_per_tok
    x_flat = x.reshape(T, H)

    # ---- Per-generation tile / VMEM sizing --------------------------------
    vmem_cap = _vmem_capacity_bytes()
    if vmem_cap >= (100 << 20):               # v5e / v6e: 128 MiB physical VMEM
        vmem_budget = int(min(vmem_cap - (24 << 20), 104 << 20))
        tm_desired, ti_desired = 1024, 512
    else:                                     # v7x: 64 MiB per TensorCore
        vmem_budget = int(max(vmem_cap - (10 << 20), 32 << 20))
        tm_desired, ti_desired = 512, 256

    if tile_i is None:
        tile_i = _pick_tile_i(I, ti_desired)
    else:
        tile_i = min(tile_i, I)
        assert I % tile_i == 0
    if tile_m is None:
        tile_m = min(tm_desired, max(8, _round_up(T * k, 8)))
        bpe = jnp.dtype(x.dtype).itemsize
        wpe = jnp.dtype(w_gate.dtype).itemsize
        while (tile_m > 64 and
               _vmem_need(tile_m, tile_i, H, bpe, wpe) + (8 << 20) > vmem_budget):
            tile_m //= 2
        tile_m = max(8, _round_up(tile_m, 8))
    assert tile_m % 8 == 0
    n_k = I // tile_i

    # ---- Router (tiny; plain JAX, always f32). Eval: no jitter/dropout. ----
    # TODO(synk): router matmul/softmax/top-k, the sort/pad dispatch and the
    # gather combine stay in plain JAX; only the expert GEMMs are Pallas.
    xf32 = x_flat.astype(jnp.float32)
    logits = jnp.dot(xf32, router_w.T.astype(jnp.float32))          # [T, E]
    probs = jax.nn.softmax(logits, axis=-1)
    _, top_e = lax.top_k(probs, k)                                  # [T, k]
    # normalize_router_prob_before_dropping=False path of TopKRouter:
    routing_w = jax.nn.softmax(
        jnp.take_along_axis(logits, top_e, axis=-1), axis=-1)       # [T, k] f32

    # ---- Dispatch: sort assignments by expert, pad each group to tile_m ----
    assign_e = top_e.reshape(-1).astype(jnp.int32)                  # [T*k]
    assign_t = jnp.repeat(jnp.arange(T, dtype=jnp.int32), k)        # [T*k]
    assign_w = routing_w.reshape(-1)

    order = jnp.argsort(assign_e, stable=True)
    sorted_e = assign_e[order]
    sorted_t = assign_t[order]
    sorted_w = assign_w[order]

    counts = jnp.bincount(assign_e, length=E).astype(jnp.int32)     # [E]
    padded_counts = ((counts + tile_m - 1) // tile_m) * tile_m      # 0 -> 0
    group_start = jnp.concatenate(
        [jnp.zeros(1, jnp.int32), jnp.cumsum(padded_counts)[:-1].astype(jnp.int32)])
    compact_start = jnp.concatenate(
        [jnp.zeros(1, jnp.int32), jnp.cumsum(counts)[:-1].astype(jnp.int32)])
    rank_in_group = jnp.arange(T * k, dtype=jnp.int32) - compact_start[sorted_e]
    dest_row = group_start[sorted_e] + rank_in_group                # [T*k]

    P = _round_up(T * k + E * (tile_m - 1), tile_m)                 # static bound
    num_m_tiles = P // tile_m

    # TODO(synk): x_pad is still materialized in HBM; an in-kernel row gather
    # (manual DMA driven by a prefetched dest->token table) would remove one
    # full [P, H] write + read of activations.
    x_pad = jnp.zeros((P, H), x.dtype).at[dest_row].set(x_flat[sorted_t])
    rw_pad = jnp.zeros((P, 1), jnp.float32).at[dest_row].set(
        sorted_w.astype(jnp.float32)[:, None])                      # pad rows -> 0

    group_end = jnp.cumsum(padded_counts).astype(jnp.int32)
    total_padded = group_end[-1]
    tile_start = jnp.arange(num_m_tiles, dtype=jnp.int32) * tile_m
    tile_expert = jnp.minimum(
        jnp.searchsorted(group_end, tile_start, side="right"), E - 1).astype(jnp.int32)
    tile_valid = (tile_start < total_padded).astype(jnp.int32)      # dead-tile mask

    # ---- Fuse gate/up: per tile_i block the slab is [Wg_tile | Wu_tile] ----
    wgu = jnp.concatenate(
        [w_gate.reshape(E, H, n_k, tile_i), w_up.reshape(E, H, n_k, tile_i)],
        axis=3).reshape(E, H, 2 * I)

    # ---- Grouped expert compute (Pallas); output already routing-scaled ----
    y_pad = grouped_swiglu(x_pad, rw_pad, tile_expert, tile_valid, wgu, w_down,
                           tile_m=tile_m, tile_i=tile_i,
                           vmem_budget=vmem_budget)                 # [P, H]

    # ---- Combine: inverse-permutation gather + sum over the k slots --------
    dest_of_assign = jnp.zeros(T * k, jnp.int32).at[order].set(dest_row)
    out_flat = jnp.sum(
        y_pad[dest_of_assign].astype(jnp.float32).reshape(T, k, H), axis=1)
    output = out_flat.astype(x.dtype).reshape(B, S, H)

    # ---- Aux losses (matches MoELayer._compute_aux_losses, eval semantics) --
    usage = jnp.mean(
        jnp.any(top_e[:, :, None] == jnp.arange(E)[None, None, :], axis=1)
        .astype(jnp.float32), axis=0)                               # [E]
    aux = {"load_balancing_loss":
           router_aux_loss_coef * E * jnp.var(usage, ddof=1)}
    if router_z_loss_coef > 0:
        z = jnp.mean(jax.nn.logsumexp(logits, axis=-1) ** 2)
        aux["z_loss"] = router_z_loss_coef * z
    return output, aux


# --------------------------------------------------------------------------
# Pure-JAX reference (dense masked combine — same math as the PyTorch module)
# --------------------------------------------------------------------------
def _reference_moe(x, router_w, w_gate, w_up, w_down, *, k):
    B, S, H = x.shape
    E = w_gate.shape[0]
    xf = x.reshape(B * S, H).astype(jnp.float32)
    logits = xf @ router_w.T.astype(jnp.float32)
    probs = jax.nn.softmax(logits, axis=-1)
    _, top_e = lax.top_k(probs, k)
    routing = jax.nn.softmax(jnp.take_along_axis(logits, top_e, axis=-1), axis=-1)
    out = jnp.zeros((B * S, H), jnp.float32)
    for e in range(E):
        g = xf @ w_gate[e].astype(jnp.float32)
        u = xf @ w_up[e].astype(jnp.float32)
        y = (g * jax.nn.sigmoid(g) * u) @ w_down[e].astype(jnp.float32)
        w_te = jnp.sum(routing * (top_e == e), axis=-1)             # 0 if not selected
        out = out + y * w_te[:, None]
    return out.reshape(B, S, H)


if __name__ == "__main__":
    # Small shapes consistent with MoEConfig (scaled down): hidden=128,
    # intermediate=1024, 8 experts, top-2, batch=2, seq=8.
    batch, seq = 2, 8
    hidden_size = 128
    intermediate_size = 1024
    num_experts = 8
    top_k = 2

    key = jax.random.PRNGKey(0)
    kx, kr, kg, ku, kd = jax.random.split(key, 5)

    x = jax.random.normal(kx, (batch, seq, hidden_size), dtype=jnp.float32)
    w_router = jax.random.normal(kr, (num_experts, hidden_size), jnp.float32) \
        * (1.0 / hidden_size ** 0.5)
    w_gate = jax.random.normal(kg, (num_experts, hidden_size, intermediate_size),
                               jnp.float32) * (1.0 / hidden_size ** 0.5)
    w_up = jax.random.normal(ku, (num_experts, hidden_size, intermediate_size),
                             jnp.float32) * (1.0 / hidden_size ** 0.5)
    w_down = jax.random.normal(kd, (num_experts, intermediate_size, hidden_size),
                               jnp.float32) * (1.0 / intermediate_size ** 0.5)

    # f32 run + tight correctness check against the dense reference.
    y, aux = sparse_moe_block_forward(x, w_router, w_gate, w_up, w_down,
                                      num_experts_per_tok=top_k)
    y = jax.block_until_ready(y)
    ref = _reference_moe(x, w_router, w_gate, w_up, w_down, k=top_k)
    assert y.shape == (batch, seq, hidden_size)
    assert jnp.allclose(y.astype(jnp.float32), ref, atol=2e-3, rtol=2e-3), \
        "mismatch vs reference"
    assert jnp.isfinite(aux["load_balancing_loss"]) and jnp.isfinite(aux["z_loss"])

    # bf16 smoke test (production dtype: halves weight HBM bytes, f32 router
    # and f32 MXU accumulation inside the kernel).
    yb, _ = sparse_moe_block_forward(
        x.astype(jnp.bfloat16), w_router.astype(jnp.bfloat16),
        w_gate.astype(jnp.bfloat16), w_up.astype(jnp.bfloat16),
        w_down.astype(jnp.bfloat16), num_experts_per_tok=top_k)
    yb = jax.block_until_ready(yb)
    assert yb.shape == (batch, seq, hidden_size)
    assert bool(jnp.all(jnp.isfinite(yb.astype(jnp.float32))))

    print("KERNEL_OK")
</pallas_src>

<mosaic_0001>
module attributes {stable_mosaic.version = 11 : i64} {
  func.func @_grouped_swiglu_kernel(%arg0: i32, %arg1: i32, %arg2: memref<9xi32, #tpu.memory_space<smem>>, %arg3: memref<9xi32, #tpu.memory_space<smem>>, %arg4: memref<32x128xf32, #tpu.memory_space<vmem>>, %arg5: memref<32x1xf32, #tpu.memory_space<vmem>>, %arg6: memref<1x128x512xf32, #tpu.memory_space<vmem>>, %arg7: memref<1x256x128xf32, #tpu.memory_space<vmem>>, %arg8: memref<32x128xf32, #tpu.memory_space<vmem>>, %arg9: memref<32x128xf32, #tpu.memory_space<vmem>>) attributes {dimension_semantics = [#tpu.dimension_semantics<parallel>, #tpu.dimension_semantics<arbitrary>], iteration_bounds = array<i64: 9, 4>, scalar_prefetch = 2 : i64, scratch_operands = 1 : i64, tpu.core_type = #tpu.core_type<tc>, window_params = [{transform_indices = @transform_0, window_bounds = array<i64: 32, 128>}, {transform_indices = @transform_1, window_bounds = array<i64: 32, 1>}, {transform_indices = @transform_2, window_bounds = array<i64: 1, 128, 512>}, {transform_indices = @transform_3, window_bounds = array<i64: 1, 256, 128>}, {transform_indices = @transform_4, window_bounds = array<i64: 32, 128>}]} {
    %0 = arith.index_cast %arg0 : i32 to index
    %1 = memref.load %arg3[%0] : memref<9xi32, #tpu.memory_space<smem>>
    %c0_i32 = arith.constant 0 : i32
    %2 = arith.cmpi sgt, %1, %c0_i32 : i32
    %c0_i32_0 = arith.constant 0 : i32
    %3 = arith.cmpi eq, %arg1, %c0_i32_0 : i32
    %4 = arith.andi %2, %3 : i1
    %5 = arith.extui %4 : i1 to i32
    %c0_i32_1 = arith.constant 0 : i32
    %6 = arith.cmpi ne, %5, %c0_i32_1 : i32
    scf.if %6 {
      %cst = arith.constant 0.000000e+00 : f32
      %13 = vector.broadcast %cst : f32 to vector<32x128xf32>
      %c0 = arith.constant 0 : index
      %c0_4 = arith.constant 0 : index
      %14 = vector.load %arg9[%c0, %c0_4] : memref<32x128xf32, #tpu.memory_space<vmem>>, vector<32x128xf32>
      tpu.vector_store %arg9[%c0, %c0_4], %13 {strides = array<i32>} : memref<32x128xf32, #tpu.memory_space<vmem>>, vector<32x128xf32>,
    } else {
    }
    %7 = arith.extui %2 : i1 to i32
    %c0_i32_2 = arith.constant 0 : i32
    %8 = arith.cmpi ne, %7, %c0_i32_2 : i32
    scf.if %8 {
      %c0 = arith.constant 0 : index
      %c0_4 = arith.constant 0 : index
      %13 = vector.load %arg4[%c0, %c0_4] : memref<32x128xf32, #tpu.memory_space<vmem>>, vector<32x128xf32>
      %c0_5 = arith.constant 0 : index
      %c0_6 = arith.constant 0 : index
      %c0_7 = arith.constant 0 : index
      %14 = vector.load %arg6[%c0_5, %c0_6, %c0_7] : memref<1x128x512xf32, #tpu.memory_space<vmem>>, vector<1x128x512xf32>
      %15 = vector.shape_cast %14 : vector<1x128x512xf32> to vector<128x512xf32>
      %cst = arith.constant dense<0.000000e+00> : vector<32x512xf32>
      %16 = tpu.matmul %13, %15, %cst {dimension_numbers = #tpu.dot_dimension_numbers<[1], [0], [0], [1], [0, 0, 1, 1], [], []>} : vector<32x128xf32>, vector<128x512xf32>, vector<32x512xf32> -> vector<32x512xf32>
      %17 = vector.extract_strided_slice %16 {offsets = [0, 0], sizes = [32, 256], strides = [1, 1]} : vector<32x512xf32> to vector<32x256xf32>
      %18 = vector.extract_strided_slice %16 {offsets = [0, 256], sizes = [32, 256], strides = [1, 1]} : vector<32x512xf32> to vector<32x256xf32>
      %19 = arith.negf %17 : vector<32x256xf32>
      %20 = math.exp %19 : vector<32x256xf32>
      %cst_8 = arith.constant 1.000000e+00 : f32
      %21 = vector.broadcast %cst_8 : f32 to vector<32x256xf32>
      %22 = arith.addf %21, %20 : vector<32x256xf32>
      %23 = arith.divf %21, %22 : vector<32x256xf32>
      %24 = arith.mulf %17, %23 : vector<32x256xf32>
      %25 = arith.mulf %24, %18 : vector<32x256xf32>
      %c0_9 = arith.constant 0 : index
      %c0_10 = arith.constant 0 : index
      %26 = vector.load %arg9[%c0_9, %c0_10] : memref<32x128xf32, #tpu.memory_space<vmem>>, vector<32x128xf32>
      %c0_11 = arith.constant 0 : index
      %c0_12 = arith.constant 0 : index
      %c0_13 = arith.constant 0 : index
      %27 = vector.load %arg7[%c0_11, %c0_12, %c0_13] : memref<1x256x128xf32, #tpu.memory_space<vmem>>, vector<1x256x128xf32>
      %28 = vector.shape_cast %27 : vector<1x256x128xf32> to vector<256x128xf32>
      %cst_14 = arith.constant dense<0.000000e+00> : vector<32x128xf32>
      %29 = tpu.matmul %25, %28, %cst_14 {dimension_numbers = #tpu.dot_dimension_numbers<[1], [0], [0], [1], [0, 0, 1, 1], [], []>} : vector<32x256xf32>, vector<256x128xf32>, vector<32x128xf32> -> vector<32x128xf32>
      %30 = arith.addf %26, %29 : vector<32x128xf32>
      %c0_15 = arith.constant 0 : index
      %c0_16 = arith.constant 0 : index
      %31 = vector.load %arg9[%c0_15, %c0_16] : memref<32x128xf32, #tpu.memory_space<vmem>>, vector<32x128xf32>
      tpu.vector_store %arg9[%c0_15, %c0_16], %30 {strides = array<i32>} : memref<32x128xf32, #tpu.memory_space<vmem>>, vector<32x128xf32>,
    } else {
    }
    %c3_i32 = arith.constant 3 : i32
    %9 = arith.cmpi eq, %arg1, %c3_i32 : i32
    %10 = arith.andi %2, %9 : i1
    %11 = arith.extui %10 : i1 to i32
    %c0_i32_3 = arith.constant 0 : i32
    %12 = arith.cmpi ne, %11, %c0_i32_3 : i32
    scf.if %12 {
      %c0 = arith.constant 0 : index
      %c0_4 = arith.constant 0 : index
      %13 = vector.load %arg9[%c0, %c0_4] : memref<32x128xf32, #tpu.memory_space<vmem>>, vector<32x128xf32>
      %c0_5 = arith.constant 0 : index
      %c0_6 = arith.constant 0 : index
      %14 = vector.load %arg5[%c0_5, %c0_6] : memref<32x1xf32, #tpu.memory_space<vmem>>, vector<32x1xf32>
      %15 = vector.broadcast %14 : vector<32x1xf32> to vector<32x128xf32>
      %16 = arith.mulf %13, %15 : vector<32x128xf32>
      %c0_7 = arith.constant 0 : index
      %c0_8 = arith.constant 0 : index
      %17 = vector.load %arg8[%c0_7, %c0_8] : memref<32x128xf32, #tpu.memory_space<vmem>>, vector<32x128xf32>
      tpu.vector_store %arg8[%c0_7, %c0_8], %16 {strides = array<i32>} : memref<32x128xf32, #tpu.memory_space<vmem>>, vector<32x128xf32>,
    } else {
    }
    return
  }
  func.func @transform_0(%arg0: i32, %arg1: i32, %arg2: memref<9xi32, #tpu.memory_space<smem>>, %arg3: memref<9xi32, #tpu.memory_space<smem>>) -> (i32, i32) {
    %0 = arith.index_cast %arg0 : i32 to index
    %1 = memref.load %arg3[%0] : memref<9xi32, #tpu.memory_space<smem>>
    %2 = arith.muli %arg0, %1 : i32
    %c0_i32 = arith.constant 0 : i32
    %c0_i32_0 = arith.constant 0 : i32
    return %2, %c0_i32 : i32, i32
  }
  func.func @transform_1(%arg0: i32, %arg1: i32, %arg2: memref<9xi32, #tpu.memory_space<smem>>, %arg3: memref<9xi32, #tpu.memory_space<smem>>) -> (i32, i32) {
    %0 = arith.index_cast %arg0 : i32 to index
    %1 = memref.load %arg3[%0] : memref<9xi32, #tpu.memory_space<smem>>
    %2 = arith.muli %arg0, %1 : i32
    %c0_i32 = arith.constant 0 : i32
    %c0_i32_0 = arith.constant 0 : i32
    return %2, %c0_i32 : i32, i32
  }
  func.func @transform_2(%arg0: i32, %arg1: i32, %arg2: memref<9xi32, #tpu.memory_space<smem>>, %arg3: memref<9xi32, #tpu.memory_space<smem>>) -> (i32, i32, i32) {
    %0 = arith.index_cast %arg0 : i32 to index
    %1 = memref.load %arg2[%0] : memref<9xi32, #tpu.memory_space<smem>>
    %2 = arith.index_cast %arg0 : i32 to index
    %3 = memref.load %arg3[%2] : memref<9xi32, #tpu.memory_space<smem>>
    %4 = arith.muli %arg1, %3 : i32
    %c0_i32 = arith.constant 0 : i32
    %c0_i32_0 = arith.constant 0 : i32
    return %1, %c0_i32, %4 : i32, i32, i32
  }
  func.func @transform_3(%arg0: i32, %arg1: i32, %arg2: memref<9xi32, #tpu.memory_space<smem>>, %arg3: memref<9xi32, #tpu.memory_space<smem>>) -> (i32, i32, i32) {
    %0 = arith.index_cast %arg0 : i32 to index
    %1 = memref.load %arg2[%0] : memref<9xi32, #tpu.memory_space<smem>>
    %2 = arith.index_cast %arg0 : i32 to index
    %3 = memref.load %arg3[%2] : memref<9xi32, #tpu.memory_space<smem>>
    %4 = arith.muli %arg1, %3 : i32
    %c0_i32 = arith.constant 0 : i32
    %c0_i32_0 = arith.constant 0 : i32
    return %1, %4, %c0_i32 : i32, i32, i32
  }
  func.func @transform_4(%arg0: i32, %arg1: i32, %arg2: memref<9xi32, #tpu.memory_space<smem>>, %arg3: memref<9xi32, #tpu.memory_space<smem>>) -> (i32, i32) {
    %c0_i32 = arith.constant 0 : i32
    %c0_i32_0 = arith.constant 0 : i32
    return %arg0, %c0_i32 : i32, i32
  }
}

</mosaic_0001>

<bundles_post_ra>
// kernel: tpu_custom_call.1
= control target key start
LH: loop header
LB: loop body
LE: loop exit
PB: predicated region body
PF: predicated region fallthrough
CT: control target
= control target key end

     0   :  { %s2484_s0 = inlined_call_operand.hbm [shape: s32[9], index: 0, kind: input, shape index: {}]   ;;  %s2485_s2 = inlined_call_operand.hbm [shape: f32[288,128], index: 2, kind: input, shape index: {}]   ;;  %s2486_s3 = inlined_call_operand.vmem [shape: f32[288,1], index: 3, kind: input, shape index: {}]   ;;  %s2487_s4 = inlined_call_operand.hbm [shape: f32[8,128,2048], index: 4, kind: input, shape index: {}]   ;;  %s2488_s5 = inlined_call_operand.hbm [shape: f32[8,1024,128], index: 5, kind: input, shape index: {}]   ;;  %s2489_s6 = inlined_call_operand.hbm [shape: f32[288,128], index: 6, kind: output, shape index: {}]   ;;  %s2490_s1 = inlined_call_operand.hbm [shape: s32[9], index: 1, kind: input, shape index: {}]  }
   0x1   :  { %2519 = sst [smem:[#allocation45_spill]] %s2485_s2  ;;  %s1466_s23 = scalar_lea.hbm %s2484_s0, 16 }
   0x2   :  { %2520 = sst [smem:[#allocation46_spill]] %s2486_s3  ;;  %p1467_p0 = scmp.ne.s32.totalorder %s2484_s0, %s1466_s23 }
   0x3   :  { %2521 = sst [smem:[#allocation47_spill]] %s2487_s4  ;;  %p1470_p1 = scmp.lt.u32.totalorder %s1466_s23, %s2484_s0 }
   0x4   :  { %2522 = sst [smem:[#allocation48_spill]] %s2488_s5 }
   0x5   :  { %2523 = sst [smem:[#allocation49_spill]] %s2489_s6  ;;  %p1472_p2 = pnand %p1470_p1, %p1467_p0 }
   0x7   :  { %1475 = shalt.err (!%p1472_p2)  }
   0x8   :  { %s1758_s28 = smov [#allocation4]   ;;  %s1476_s9 = scalar_lea.hbm %s2490_s1, 16 }
   0x9   :  { %12 = dma.hbm_to_smem %s2484_s0, 16, %s1758_s28, [#allocation3] }
   0xa   :  { %p1477_p3 = scmp.ne.s32.totalorder %s2490_s1, %s1476_s9  ;;  %p1480_p4 = scmp.lt.u32.totalorder %s1476_s9, %s2490_s1 }
   0xc   :  { %p1482_p5 = pnand %p1480_p4, %p1477_p3 }
   0xe   :  { %1485 = shalt.err (!%p1482_p5)  }
   0xf   :  { %s1759_s14 = smov [#allocation5]  }
  0x10   :  { %14 = dma.hbm_to_smem %s2490_s1, 16, %s1759_s14, [#allocation3] }
  0x11   :  { %1672 = dma.done.wait [#allocation3], 32 }
  0x12   :  { %1673 = vsyncadd [#allocation3], 4294967264 }
  0x13   :  { %16 = sfence }
  0x14   :  { %17 = vsyncpa [#allocation7], 0 }
  0x15   :  { %19 = vsyncpa [#allocation7 + $0x1], 0 }
  0x16   :  { %20 = vsyncpa [#allocation10], 0 }
  0x17   :  { %22 = vsyncpa [#allocation10 + $0x1], 0 }
  0x18   :  { %23 = vsyncpa [#allocation8], 0 }
  0x19   :  { %25 = vsyncpa [#allocation8 + $0x1], 0  ;;  %s1833_s0 = smov 0   ;;  %s1835_s17 = smov 0  }
  0x1a   :  { %s1837_s18 = smov 0   ;;  %s1839_s19 = smov 0  }
  0x1b   :  { %s1841_s20 = smov 0   ;;  %s1843_s1 = smov 0  }
  0x1c   :  { %s1845_s21 = smov 0   ;;  %s1847_s22 = smov 0  }
  0x1d   :  { %s1849_s23 = smov 0   ;;  %s1851_s24 = smov 0  }
  0x1e   :  { %s1853_s25 = smov 0   ;;  %s1855_s26 = smov 0  }
  0x1f   :  { %s1857_s27 = smov 0   ;;  %s1859_s28 = smov 0  }
  0x20   :  { %s1861_s29 = smov 0   ;;  %s1863_s30 = smov 0  }
  0x21   :  { %s1865_s7 = smov 0  }
  0x22 LB: > { %2524 = sst [smem:[#allocation28_spill]] %s1692_s0  ;;  %s1917_s8 = sadd.s32 4294967295, %s1756_s7   ;;  %s1756_s7 = sphi %s1865_s7, %s31_s7   ;;  %s1752_s30 = sphi %s1863_s30, %s2611_s30   ;;  %s1748_s29 = sphi %s1861_s29, %s2610_s29   ;;  %s1744_s28 = sphi %s1859_s28, %s2609_s28   ;;  %s1740_s27 = sphi %s1857_s27, %s2608_s27   ;;  %s1736_s26 = sphi %s1855_s26, %s2600_s26   ;;  %s1732_s25 = sphi %s1853_s25, %s2607_s25   ;;  %s1728_s24 = sphi %s1851_s24, %s2606_s24   ;;  %s1724_s23 = sphi %s1849_s23, %s2598_s23   ;;  %s1720_s22 = sphi %s1847_s22, %s2597_s22   ;;  %s1716_s21 = sphi %s1845_s21, %s2596_s21   ;;  %s1712_s1 = sphi %s1843_s1, %s2605_s1   ;;  %s1708_s20 = sphi %s1841_s20, %s2604_s20   ;;  %s1704_s19 = sphi %s1839_s19, %s2603_s19   ;;  %s1700_s18 = sphi %s1837_s18, %s2595_s18   ;;  %s1696_s17 = sphi %s1835_s17, %s2594_s17   ;;  %s1692_s0 = sphi %s1833_s0, %s2593_s0  }
  0x23   : > { %2525 = sst [smem:[#allocation29_spill]] %s1696_s17  ;;  %s40_s10 = sadd.s32 1, %s1748_s29 }
  0x24   : > { %2526 = sst [smem:[#allocation30_spill]] %s1700_s18  ;;  %p41_p6 = scmp.ge.s32.totalorder %s40_s10, 4 }
  0x25   : > { %2527 = sst [smem:[#allocation31_spill]] %s1720_s22  ;;  %s43_s11 = sadd.s32 1, %s1752_s30 }
  0x26   : > { %2528 = sst [smem:[#allocation32_spill]] %s1724_s23  ;;  %p2507_p7 = scmp.eq.s32.totalorder %s1756_s7, 0 }
  0x27   : > { %2529 = sst [smem:[#allocation33_spill]] %s1736_s26  ;;  %p2506_p8 = scmp.eq.s32.totalorder %s1917_s8, 0 }
  0x28   : > { %2530 = sst [smem:[#allocation34_spill]] %s1740_s27  ;;  %s2613_s10 = smov (%p41_p6, %s40_s10), 0 }
  0x29   : > { %2531 = sst [smem:[#allocation35_spill]] %s1744_s28  ;;  %s2615_s11 = smov (!%p41_p6, %s43_s11), %s1752_s30 }
  0x2a   : > { %2532 = sst [smem:[#allocation36_spill]] %s2613_s10  ;;  %p45_p9 = scmp.ge.s32.totalorder %s2615_s11, 9 }
  0x2b   : > { %s107_s12 = sld [smem:[#allocation4 + %s1752_s30]]  ;;  %s118_s14 = sadd.s32 1, %s1724_s23 }
  0x2c   : > { %s108_s13 = sld [smem:[#allocation5 + %s1752_s30]]  ;;  %p125_p10 = scmp.ne.s32.totalorder %s1724_s23, %s1720_s22 }
  0x2d   : > { %p131_p11 = scmp.ne.s32.totalorder %s1720_s22, %s1716_s21  ;;  %s2617_s11 = smov (%p45_p9, %s2615_s11), 0 }
  0x2e   : > { %2533 = sst [smem:[#allocation37_spill]] %s2617_s11  ;;  %p1948_p13 = por %p125_p10, %p2507_p7 }
  0x2f   : > { %p1937_p12 = por %p131_p11, %p2506_p8  ;;  %s1942_s16 = sld [smem:[#allocation5 + %s1752_s30]] }
  0x30   : > { %s110_s9 = sld [smem:[#allocation4 + %s2617_s11]]  ;;  %s175_s21 = ssub.s32 %s1752_s30, %s2617_s11 }
  0x31   : > { %s2534_s15 = scalar_select %p1937_p12, 1, 0 }
  0x32   : > { %s111_s6 = sld [smem:[#allocation5 + %s2617_s11]]  ;;  %p176_p0 = scmp.eq.s32.totalorder %s175_s21, 0 }
  0x33   : > { %2535 = sst [smem:[#allocation38_spill]] %s2534_s15  ;;  %s178_s27 = sadd.s32 1, %s1700_s18 }
  0x34   : > { %s109_s28 = smul.u32 %s1748_s29, %s108_s13  ;;  %p188_p1 = scmp.ne.s32.totalorder %s1700_s18, %s1696_s17 }
  0x35   : > { %s1959_s15 = scalar_select %p176_p0, %s1700_s18, %s178_s27  }
  0x36   : > { %p189_p2 = scmp.eq.s32.totalorder %s1917_s8, 35  ;;  %p194_p3 = scmp.ne.s32.totalorder %s1696_s17, %s1692_s0 }
  0x37   : > { %2537 = sst [smem:[#allocation39_spill]] %s1959_s15  ;;  %s113_s5 = ssub.s32 %s107_s12, %s110_s9 }
  0x38   : > { %s112_s22 = smul.u32 %s111_s6, %s2613_s10  ;;  %p1965_p4 = por %p189_p2, %p188_p1 }
  0x39   : > { %s2540_s13 = sadd.s32 4294967294, %s1756_s7   ;;  %p2505_p10 = scmp.lt.s32.totalorder %s1756_s7, 36 }
  0x3a   : > { %s2538_s21 = scalar_select %p1965_p4, 1, 0 }
  0x3b   : > { %p195_p5 = scmp.eq.s32.totalorder %s2540_s13, 35  ;;  %s114_s27 = ssub.s32 %s109_s28, %s112_s22 }
  0x3c   : > { %2539 = sst [smem:[#allocation40_spill]] %s2538_s21  ;;  %s115_s15 = sor.u32 %s114_s27, %s113_s5 }
  0x3d   : > { %p1971_p6 = por %p195_p5, %p194_p3  ;;  %p116_p9 = scmp.eq.s32.totalorder %s115_s15, 0 }
  0x3e   : > { %s251_s6 = sand.u32 1, %s1756_s7   ;;  %s253_s9 = sand.u32 1, %s1724_s23  }
  0x3f   : > { %s2541_s18 = scalar_select %p1971_p6, 1, 0 }
  0x40   : > { %s1979_s12 = scalar_select %p116_p9, %s1724_s23, %s118_s14  }
  0x41   : > { %2542 = sst [smem:[#allocation41_spill]] %s2541_s18  ;;  %s1053_s0 = sshll.u32 %s253_s9, 9 }
  0x42   : > { %2543 = sst [smem:[#allocation42_spill]] %s1979_s12  ;;  %p1985_p11 = pnand %p2505_p10, %p1948_p13 }
  0x43   : > { %s1243_s5 = scalar_select %p1948_p13, [#allocation4], [#allocation14] }
  0x44   : > { %s1244_s22 = scalar_select %p1948_p13, %s1752_s30, 0 }
  0x45   : > { %s2619_s5 = smov (!%p2505_p10, %s1243_s5), [#allocation19]  ;;  %s255_s15 = scalar_lea.vmem [#allocation9], %s1053_s0 }
  0x46   : > { %s2621_s22 = smov (!%p2505_p10, %s1244_s22), 0  ;;  %s267_s27 = sshll.u32 %s255_s15, 4  ;;  %s2002_s27 = int_to_ptr.vmem [resolvable:$true] %s267_s27 }
  0x47   : > { %s1245_s28 = scalar_select %p1948_p13, [#allocation5], [#allocation15] }
  0x48   : > { %s256_s14 = sld [smem:[%s2619_s5 + %s2621_s22]]  ;;  %p1061_p0 = scmp.ge.s32.totalorder %s1756_s7, 1 }
  0x49   : > { %s2623_s28 = smov (!%p2505_p10, %s1245_s28), [#allocation20]  ;;  %p301_p1 = scmp.lt.s32.totalorder %s1756_s7, 37 }
  0x4a   : > { %s257_s9 = sld [smem:[%s2623_s28 + %s2621_s22]]  ;;  %s2019_s28 = scalar_lea.sflag [#allocation10], %s251_s6 }
  0x4b   : > { %p2006_p2 = pnand %p1061_p0, %p301_p1  ;;  %s2546_s4 = sld [smem:[#allocation47_spill]] }
  0x4c   : > { %s2017_s22 = sld [smem:[#allocation5 + %s1752_s30]]  ;;  %p1488_p3 = pneg %p1985_p11 }
  0x4d   : > { %s2545_s23 = scalar_select %p2006_p2, 1, 0 }
  0x4e   : > { %s1055_s12 = sshll.u32 %s256_s14, 8 }
  0x50   : > { %s258_s3 = smul.u32 %s1748_s29, %s257_s9 }
  0x52   : > { %s1054_s18 = sshll.u32 %s258_s3, 2 }
  0x53   : > { %s264_s21 = sadd.s32 %s1055_s12, %s1054_s18  ;;  %s1491_s12 = scalar_lea.hbm %s2546_s4, 262144 }
  0x54   : > { %s1056_s5 = sshll.u32 %s264_s21, 7 }
  0x55   : > { %s2014_s17 = scalar_lea.hbm %s2546_s4, %s1056_s5 }
  0x56   : > { %s1486_s14 = scalar_lea.hbm %s2014_s17, 8192  ;;  %p1492_p0 = scmp.lt.u32.totalorder %s2014_s17, %s2546_s4 }
  0x57   : > { %p1487_p13 = scmp.ne.s32.totalorder %s2014_s17, %s1486_s14  ;;  %p1493_p1 = scmp.lt.u32.totalorder %s1491_s12, %s1486_s14 }
  0x58   : > { %p1495_p8 = scmp.lt.u32.totalorder %s1486_s14, %s2014_s17 }
  0x59   : > { %p1489_p5 = pnand %p1488_p3, %p1487_p13  ;;  %p1494_p10 = por %p1493_p1, %p1492_p0 }
  0x5b   : > { %p1490_p9 = pneg %p1489_p5  ;;  %p1496_p7 = por %p1495_p8, %p1494_p10 }
  0x5d   : > { %p1497_p6 = pnand %p1496_p7, %p1490_p9 }
  0x5f   : > { %1500 = shalt.err (!%p1497_p6)
}
  0x60   : > { %s1501_s6 = scalar_lea.vmem %s2002_s27, 8192  ;;  %s1760_s5 = smov [#allocation9]  }
  0x61   : > { %p1502_p13 = scmp.ne.s32.totalorder %s2002_s27, %s1501_s6  ;;  %s1506_s0 = sshll.u32 %s1760_s5, 4  ;;  %s1507_s0 = int_to_ptr.vmem [resolvable:$false] %s1506_s0 }
  0x62   : > { %s1508_s15 = scalar_lea.vmem %s1507_s0, 16384  ;;  %p1509_p12 = scmp.lt.s32.totalorder %s2002_s27, %s1507_s0 }
  0x63   : > { %p1504_p5 = pnand %p1502_p13, %p1488_p3  ;;  %p1510_p0 = scmp.lt.s32.totalorder %s1508_s15, %s1501_s6 }
  0x65   : > { %p1505_p4 = pneg %p1504_p5  ;;  %p1511_p1 = por %p1510_p0, %p1509_p12 }
  0x67   : > { %p1512_p8 = pnand %p1511_p1, %p1505_p4 }
  0x69   : > { %1515 = shalt.err (!%p1512_p8)
}
  0x6a   : > { %s1761_s14 = smov 2048   ;;  %s1762_s18 = smov 512  }
  0x6b   : > { %s1763_s21 = smov 32   ;;  %s49_s12 = sld [smem:[#allocation5 + %s2617_s11]] }
  0x6c   : > { %1270 = dma.hbm_to_vmem [thread:$0]  (!%p1985_p11), %s2014_s17, 8192, %s2002_s27, %s2019_s28, %s1761_s14, %s1762_s18, %s1763_s21  }
  0x6d   : > { %p61_p7 = scmp.ne.s32.totalorder %s1736_s26, %s1732_s25  ;;  %p67_p12 = scmp.ne.s32.totalorder %s1732_s25, %s1728_s24 }
  0x6e   : > { %s215_s3 = sand.u32 1, %s1736_s26   ;;  %p2547_p4 = scmp.eq.s32.totalorder %s1756_s7, 0 }
  0x6f   : > { %p2549_p10 = scmp.eq.s32.totalorder %s1917_s8, 0  ;;  %s48_s13 = smul.u32 %s1752_s30, %s2017_s22 }
  0x70   : > { %p2057_p6 = por %p2547_p4, %p61_p7  ;;  %s54_s24 = sadd.s32 1, %s1736_s26 }
  0x71   : > { %p2063_p3 = por %p2549_p10, %p67_p12  ;;  %s50_s27 = smul.u32 %s49_s12, %s2617_s11 }
  0x72   : > { %s1050_s5 = sshll.u32 %s215_s3, 5  ;;  %p2551_p11 = scmp.lt.s32.totalorder %s1756_s7, 36 }
  0x73   : > { %s2550_s17 = scalar_select %p2063_p3, 1, 0 }
  0x74   : > { %s1240_s0 = scalar_select %p2057_p6, [#allocation5], [#allocation13] }
  0x75   : > { %s51_s15 = ssub.s32 %s48_s13, %s50_s27  ;;  %p2077_p9 = pnand %p2551_p11, %p2057_p6 }
  0x76   : > { %p52_p13 = scmp.eq.s32.totalorder %s51_s15, 0  ;;  %p2554_p5 = pmov %p2551_p11 }
  0x77   : > { %s1241_s22 = scalar_select %p2057_p6, %s1752_s30, 0 }
  0x78   : > { %s2085_s18 = scalar_select %p52_p13, %s1736_s26, %s54_s24  }
  0x79   : > { %s2625_s0 = smov (!%p2554_p5, %s1240_s0), [#allocation18]  ;;  %p2555_p0 = pmov %p2554_p5 }
  0x7a   : > { %2553 = sst [smem:[#allocation43_spill]] %s2085_s18  ;;  %s219_s21 = scalar_lea.vmem [#allocation6], %s1050_s5 }
  0x7b   : > { %s2627_s22 = smov (!%p2555_p0, %s1241_s22), 0  ;;  %s228_s12 = sshll.u32 %s219_s21, 4  ;;  %s2105_s12 = int_to_ptr.vmem [resolvable:$true] %s228_s12 }
  0x7c   : > { %s220_s13 = sld [smem:[%s2625_s0 + %s2627_s22]]  ;;  %p159_p1 = scmp.ne.s32.totalorder %s1712_s1, %s1708_s20 }
  0x7d   : > { %s2092_s27 = sld [smem:[#allocation4 + %s1752_s30]]  ;;  %p165_p8 = scmp.ne.s32.totalorder %s1708_s20, %s1704_s19 }
  0x7e   : > { %s2095_s9 = sld [smem:[#allocation4 + %s2617_s11]]  ;;  %p2556_p7 = pmov %p2549_p10 }
  0x7f   : > { %s2098_s15 = sld [smem:[#allocation5 + %s2617_s11]]  ;;  %p2120_p6 = por %p159_p1, %p2547_p4 }
  0x80   : > { %p2109_p12 = por %p165_p8, %p2556_p7  ;;  %s2559_s2 = sld [smem:[#allocation45_spill]] }
  0x81   : > { %s2124_s21 = scalar_lea.sflag [#allocation7], %s215_s3  ;;  %p1518_p11 = pneg %p2077_p9 }
  0x82   : > { %s221_s6 = smul.u32 %s1752_s30, %s220_s13 }
  0x83   : > { %s2557_s4 = scalar_select %p2109_p12, 1, 0 }
  0x84   : > { %s1082_s24 = sshll.u32 %s221_s6, 9 }
  0x85   : > { %2558 = sst [smem:[#allocation44_spill]] %s2557_s4 }
  0x86   : > { %s2116_s22 = scalar_lea.hbm %s2559_s2, %s1082_s24  ;;  %s1521_s5 = scalar_lea.hbm %s2559_s2, 4608 }
  0x87   : > { %s1516_s13 = scalar_lea.hbm %s2116_s22, 512  ;;  %p1522_p0 = scmp.lt.u32.totalorder %s2116_s22, %s2559_s2 }
  0x88   : > { %p1517_p10 = scmp.ne.s32.totalorder %s2116_s22, %s1516_s13  ;;  %p1523_p1 = scmp.lt.u32.totalorder %s1521_s5, %s1516_s13 }
  0x89   : > { %p1525_p7 = scmp.lt.u32.totalorder %s1516_s13, %s2116_s22 }
  0x8a   : > { %p1519_p13 = pnand %p1518_p11, %p1517_p10  ;;  %p1524_p8 = por %p1523_p1, %p1522_p0 }
  0x8c   : > { %p1520_p5 = pneg %p1519_p13  ;;  %p1526_p4 = por %p1525_p7, %p1524_p8 }
  0x8e   : > { %p1527_p12 = pnand %p1526_p4, %p1520_p5 }
  0x90   : > { %1530 = shalt.err (!%p1527_p12)
}
  0x91   : > { %s1531_s3 = scalar_lea.vmem %s2105_s12, 512  ;;  %s1764_s6 = smov [#allocation6]  }
  0x92   : > { %p1532_p10 = scmp.ne.s32.totalorder %s2105_s12, %s1531_s3  ;;  %s1536_s24 = sshll.u32 %s1764_s6, 4  ;;  %s1537_s24 = int_to_ptr.vmem [resolvable:$false] %s1536_s24 }
  0x93   : > { %s1538_s11 = scalar_lea.vmem %s1537_s24, 1024  ;;  %p1539_p2 = scmp.lt.s32.totalorder %s2105_s12, %s1537_s24 }
  0x94   : > { %p1534_p13 = pnand %p1532_p10, %p1518_p11  ;;  %p1540_p0 = scmp.lt.s32.totalorder %s1538_s11, %s1531_s3 }
  0x96   : > { %p1535_p3 = pneg %p1534_p13  ;;  %p1541_p1 = por %p1540_p0, %p1539_p2 }
  0x98   : > { %p1542_p8 = pnand %p1541_p1, %p1535_p3 }
  0x9a   : > { %1545 = shalt.err (!%p1542_p8)
}
  0x9b   : > { %s2516_s13 = smov 128   ;;  %s2517_s5 = smov 8  }
  0x9c   : > { %1263 = dma.hbm_to_vmem [thread:$0]  (!%p2077_p9), %s2116_s22, 512, %s2105_s12, %s2124_s21, %s2516_s13, %s2516_s13, %s2517_s5  }
  0x9d   : > { %s146_s0 = smul.u32 %s2098_s15, %s2613_s10  ;;  %s147_s3 = ssub.s32 %s2092_s27, %s2095_s9 }
  0x9e   : > { %p2561_p2 = scmp.lt.s32.totalorder %s1756_s7, 36  ;;  %s2563_s24 = smul.u32 %s1748_s29, %s1942_s16 }
  0x9f   : > { %s152_s2 = sadd.s32 1, %s1712_s1  ;;  %s279_s26 = sand.u32 1, %s1712_s1  }
  0xa0   : > { %p2163_p3 = pnand %p2561_p2, %p2120_p6  ;;  %s148_s11 = ssub.s32 %s2563_s24, %s146_s0 }
  0xa1   : > { %s149_s18 = sor.u32 %s148_s11, %s147_s3  ;;  %p2564_p9 = pmov %p2561_p2 }
  0xa2   : > { %p150_p12 = scmp.eq.s32.totalorder %s149_s18, 0  ;;  %p2565_p11 = pmov %p2561_p2 }
  0xa3   : > { %s1248_s14 = scalar_select %p2120_p6, [#allocation4], [#allocation16] }
  0xa4   : > { %s2175_s4 = scalar_select %p150_p12, %s1712_s1, %s152_s2  }
  0xa5   : > { %s1249_s12 = scalar_select %p2120_p6, %s1752_s30, 0 }
  0xa6   : > { %s2629_s14 = smov (!%p2564_p9, %s1248_s14), [#allocation21]  ;;  %p2566_p5 = pmov %p2561_p2 }
  0xa7   : > { %s2631_s12 = smov (!%p2565_p11, %s1249_s12), 0  ;;  %s1057_s27 = sshll.u32 %s279_s26, 8 }
  0xa8   : > { %s1250_s9 = scalar_select %p2120_p6, [#allocation5], [#allocation17] }
  0xa9   : > { %s282_s16 = sld [smem:[%s2629_s14 + %s2631_s12]]  ;;  %s281_s18 = scalar_lea.vmem [#allocation11], %s1057_s27 }
  0xaa   : > { %s2633_s9 = smov (!%p2566_p5, %s1250_s9), [#allocation22]  ;;  %s293_s22 = sshll.u32 %s281_s18, 4  ;;  %s2189_s22 = int_to_ptr.vmem [resolvable:$true] %s293_s22 }
  0xab   : > { %s283_s15 = sld [smem:[%s2633_s9 + %s2631_s12]]  ;;  %p1548_p7 = pneg %p2163_p3 }
  0xac   : > { %s2567_s19 = sld [smem:[#allocation48_spill]] }
  0xaf   : > { %s1059_s2 = sshll.u32 %s282_s16, 7 }
  0xb1   : > { %s284_s21 = smul.u32 %s1748_s29, %s283_s15 }
  0xb2   : > { %s2568_s5 = smov %s2567_s19 }
  0xb3   : > { %s1058_s0 = sshll.u32 %s284_s21, 5  ;;  %s1551_s9 = scalar_lea.hbm %s2568_s5, 131072 }
  0xb4   : > { %s290_s3 = sadd.s32 %s1059_s2, %s1058_s0 }
  0xb5   : > { %s1060_s24 = sshll.u32 %s290_s3, 7 }
  0xb6   : > { %s2194_s10 = scalar_lea.hbm %s2567_s19, %s1060_s24 }
  0xb7   : > { %s1546_s26 = scalar_lea.hbm %s2194_s10, 4096  ;;  %p1552_p13 = scmp.lt.u32.totalorder %s2194_s10, %s2568_s5 }
  0xb8   : > { %p1547_p6 = scmp.ne.s32.totalorder %s2194_s10, %s1546_s26  ;;  %p1553_p0 = scmp.lt.u32.totalorder %s1551_s9, %s1546_s26 }
  0xb9   : > { %p1555_p8 = scmp.lt.u32.totalorder %s1546_s26, %s2194_s10 }
  0xba   : > { %p1549_p4 = pnand %p1548_p7, %p1547_p6  ;;  %p1554_p1 = por %p1553_p0, %p1552_p13 }
  0xbc   : > { %p1550_p10 = pneg %p1549_p4  ;;  %p1556_p2 = por %p1555_p8, %p1554_p1 }
  0xbe   : > { %p1557_p12 = pnand %p1556_p2, %p1550_p10 }
  0xc0   : > { %1560 = shalt.err (!%p1557_p12)
}
  0xc1   : > { %s1561_s27 = scalar_lea.vmem %s2189_s22, 4096  ;;  %s1767_s15 = smov [#allocation11]  }
  0xc2   : > { %p1562_p9 = scmp.ne.s32.totalorder %s2189_s22, %s1561_s27  ;;  %s1566_s18 = sshll.u32 %s1767_s15, 4  ;;  %s1567_s18 = int_to_ptr.vmem [resolvable:$false] %s1566_s18 }
  0xc3   : > { %s1568_s21 = scalar_lea.vmem %s1567_s18, 8192  ;;  %p1569_p6 = scmp.lt.s32.totalorder %s2189_s22, %s1567_s18 }
  0xc4   : > { %p1564_p11 = pnand %p1562_p9, %p1548_p7  ;;  %p1570_p4 = scmp.lt.s32.totalorder %s1568_s21, %s1561_s27 }
  0xc6   : > { %p1565_p5 = pneg %p1564_p11  ;;  %p1571_p13 = por %p1570_p4, %p1569_p6 }
  0xc8   : > { %p1572_p0 = pnand %p1571_p13, %p1565_p5 }
  0xca   : > { %1575 = shalt.err (!%p1572_p0)
}
  0xcb   : > { %s2569_s2 = smov 8   ;;  %s2570_s0 = smov 128  }
  0xcc   : > { %1277 = dma.hbm_to_vmem [thread:$0]  (!%p2163_p3), %s2194_s10, 4096, %s2189_s22, %s2019_s28, %s2570_s0, %s2570_s0, %s2569_s2  }
  0xcd   : > { %p2571_p7 = scmp.ne.s32.totalorder %s2545_s23, 0 }
  0xce   : > { %s307_s3 = sand.u32 (!%p2571_p7), 1, %s1732_s25   ;;  %p2572_p10 = scmp.ne.s32.totalorder (!%p2571_p7), %s2550_s17, 0 }
  0xcf   : > { %305 = sbr.rel (%p2571_p7) target bundleno = 945 (0x3b1), region = 36  ;;  %s1062_s24 = sshll.u32 (!%p2571_p7), %s307_s3, 5 }
  0xd0   : > { %s308_s11 = scalar_lea.sflag (!%p2571_p7), [#allocation7], %s307_s3  ;;  %s2228_s19 = scalar_lea.vmem (!%p2571_p7), [#allocation6], %s1062_s24 }
  0xd6   : > { %1675 = dma.done.wait (%p2572_p10), %s308_s11, 512  }
  0xd7   : > { %1677 = vsyncadd (%p2572_p10), %s308_s11, 4294966784  ;;  %s2573_s6 = sld [smem:[#allocation31_spill]]  ;;  %s2574_s26 = sld [smem:[#allocation38_spill]] }
  0xd8   : > { %s316_s14 = sand.u32 1, %s1917_s8  }
  0xd9   : > { %s317_s23 = scalar_lea.sflag [#allocation10], %s316_s14 }
  0xdd   : > { %s318_s10 = sand.u32 1, %s2573_s6   ;;  %p2575_p3 = scmp.ne.s32.totalorder %s2574_s26, 0 }
  0xde   : > { %s1063_s28 = sshll.u32 %s318_s10, 9 }
  0xdf   : > { %s2236_s22 = scalar_lea.vmem [#allocation9], %s1063_s28 }
  0xe0   : > { %1679 = dma.done.wait (%p2575_p3), %s317_s23, 8192  }
  0xe1   : > { %1681 = vsyncadd (%p2575_p3), %s317_s23, 4294959104  ;;  %s2576_s12 = sld [smem:[#allocation44_spill]]  ;;  %s327_s9 = sand.u32 1, %s1708_s20  }
  0xe2   : > { %s1064_s16 = sshll.u32 %s327_s9, 8 }
  0xe3   : > { %s2243_s17 = scalar_lea.vmem [#allocation11], %s1064_s16 }
  0xe7   : > { %p2577_p1 = scmp.ne.s32.totalorder %s2576_s12, 0 }
  0xe9   : > { %1683 = dma.done.wait (%p2577_p1), %s317_s23, 4096  }
  0xea   : > { %1685 = vsyncadd (%p2577_p1), %s317_s23, 4294963200  ;;  %s2578_s8 = sld [smem:[#allocation29_spill]]  ;;  %s2579_s13 = sld [smem:[#allocation35_spill]] }
  0xeb   : > { %s2580_s27 = sld [smem:[#allocation34_spill]]  ;;  %s2581_s26 = sld [smem:[#allocation46_spill]] }
  0xf0   : > { %s368_s15 = sand.u32 1, %s2578_s8   ;;  %s374_s18 = sld [smem:[#allocation5 + %s2579_s13]] }
  0xf1   : > { %s2252_s21 = sld [smem:[#allocation5 + %s2579_s13]]  ;;  %s1065_s2 = sshll.u32 %s368_s15, 5 }
  0xf2   : > { %p395_p8 = scmp.eq.s32.totalorder %s2580_s27, 0  ;;  %s2266_s10 = scalar_lea.vmem [#allocation12], %s1065_s2 }
  0xf6   : > { %s375_s0 = smul.u32 %s2579_s13, %s374_s18 }
  0xf7   : > { %p394_p2 = scmp.gt.s32.totalorder %s2252_s21, 0 }
  0xf8   : > { %s1066_s3 = sshll.u32 %s375_s0, 2 }
  0xf9   : > { %p396_p12 = pnand %p395_p8, %p394_p2  ;;  %p377_p9 = scmp.lt.s32.totalorder %s1066_s3, 35 }
  0xfa   : > { %v1768_v0 = vmov (!%p396_p12), 0.0  }
  0xfb   : > { %s2635_s3 = smov (!%p377_p9, %s1066_s3), 35  ;;  %399 = sbr.rel (%p396_p12) target bundleno = 258 (0x102), region = 52 }
  0xfc   : > { %s1067_s24 = sshll.u32 %s2635_s3, 3  ;;  %400 = vst [vmem:[#allocation2] sm:$0xff] (!%p396_p12), %v1768_v0  ;;  %401 = vst [vmem:[#allocation2 + $0x8] sm:$0xff] (!%p396_p12), %v1768_v0 }
  0xfd   : > { %s2264_s14 = scalar_lea.vmem %s2581_s26, %s1067_s24  ;;  %402 = vst [vmem:[#allocation2 + $0x10] sm:$0xff] (!%p396_p12), %v1768_v0  ;;  %403 = vst [vmem:[#allocation2 + $0x18] sm:$0xff] (!%p396_p12), %v1768_v0 }
 0x102 PF: > { %p1068_p11 = scmp.le.s32.totalorder %s2252_s21, 0 }
 0x103   : > { %v412_v1 = vld [vmem:[%s2236_s22 + $0x8] sm:$0xff] (!%p1068_p11)  ;;  %v411_v3 = vld [vmem:[%s2236_s22] sm:$0xff] (!%p1068_p11)  ;;  %v1769_v8 = vmov (!%p1068_p11), 0.0   ;;  %v414_v25 = vld [vmem:[%s2236_s22 + $0x18] sm:$0xff] (!%p1068_p11) }
 0x104   : > { %406 = sbr.rel (%p1068_p11) target bundleno = 771 (0x303), region = 56  ;;  %v416_v2 = vld [vmem:[%s2236_s22 + $0x28] sm:$0xff] (!%p1068_p11)  ;;  %v415_v5 = vld [vmem:[%s2236_s22 + $0x20] sm:$0xff] (!%p1068_p11)  ;;  %539 = vmatprep.mubr.f32.mxu0 (!%p1068_p11), %v1769_v8  ;;  %628 = vmatprep.mubr.f32.mxu1 (!%p1068_p11), %v1769_v8  ;;  %v418_v26 = vld [vmem:[%s2236_s22 + $0x38] sm:$0xff] (!%p1068_p11) }
 0x105   : > { %v1128_v4 = vpack.c.bf16 (!%p1068_p11), %v416_v2, %v412_v1  ;;  %v420_v6 = vld [vmem:[%s2236_s22 + $0x48] sm:$0xff] (!%p1068_p11)  ;;  %v1130_v9 = vpack.c.bf16 (!%p1068_p11), %v415_v5, %v411_v3  ;;  %v419_v11 = vld [vmem:[%s2236_s22 + $0x40] sm:$0xff] (!%p1068_p11)  ;;  %v1160_v29 = vpack.c.bf16 (!%p1068_p11), %v418_v26, %v414_v25  ;;  %v413_v30 = vld [vmem:[%s2236_s22 + $0x10] sm:$0xff] (!%p1068_p11) }
 0x106   : > { %v424_v7 = vld [vmem:[%s2236_s22 + $0x68] sm:$0xff] (!%p1068_p11)  ;;  %v423_v12 = vld [vmem:[%s2236_s22 + $0x60] sm:$0xff] (!%p1068_p11)  ;;  %v417_v32 = vld [vmem:[%s2236_s22 + $0x30] sm:$0xff] (!%p1068_p11) }
 0x107   : > { %v1132_v10 = vpack.c.bf16 (!%p1068_p11), %v424_v7, %v420_v6  ;;  %v428_v13 = vld [vmem:[%s2236_s22 + $0x88] sm:$0xff] (!%p1068_p11)  ;;  %1129 = vmatprep.subr.bf16.mxu0 (!%p1068_p11), %v1128_v4  ;;  %v1134_v15 = vpack.c.bf16 (!%p1068_p11), %v423_v12, %v419_v11  ;;  %v427_v17 = vld [vmem:[%s2236_s22 + $0x80] sm:$0xff] (!%p1068_p11)  ;;  %1161 = vmatprep.subr.bf16.mxu1 (!%p1068_p11), %v1160_v29  ;;  %v1162_v35 = vpack.c.bf16 (!%p1068_p11), %v417_v32, %v413_v30  ;;  %v422_v36 = vld [vmem:[%s2236_s22 + $0x58] sm:$0xff] (!%p1068_p11) }
 0x108   : > { %v432_v14 = vld [vmem:[%s2236_s22 + $0xa8] sm:$0xff] (!%p1068_p11)  ;;  %1131 = vmatpush1.bf16.msra.mxu0 (!%p1068_p11), %v1130_v9  ;;  %v431_v18 = vld [vmem:[%s2236_s22 + $0xa0] sm:$0xff] (!%p1068_p11)  ;;  %v426_v37 = vld [vmem:[%s2236_s22 + $0x78] sm:$0xff] (!%p1068_p11) }
 0x109   : > { %1133 = vmatprep.subr.bf16.mxu0 (!%p1068_p11), %v1132_v10  ;;  %v1136_v16 = vpack.c.bf16 (!%p1068_p11), %v432_v14, %v428_v13  ;;  %v436_v19 = vld [vmem:[%s2236_s22 + $0xc8] sm:$0xff] (!%p1068_p11)  ;;  %v1138_v21 = vpack.c.bf16 (!%p1068_p11), %v431_v18, %v427_v17  ;;  %v435_v22 = vld [vmem:[%s2236_s22 + $0xc0] sm:$0xff] (!%p1068_p11)  ;;  %v1164_v39 = vpack.c.bf16 (!%p1068_p11), %v426_v37, %v422_v36  ;;  %v421_v40 = vld [vmem:[%s2236_s22 + $0x50] sm:$0xff] (!%p1068_p11)  ;;  %1163 = vmatpush1.bf16.msra.mxu1 (!%p1068_p11), %v1162_v35 }
 0x10a   : > { %v440_v20 = vld [vmem:[%s2236_s22 + $0xe8] sm:$0xff] (!%p1068_p11)  ;;  %v439_v24 = vld [vmem:[%s2236_s22 + $0xe0] sm:$0xff] (!%p1068_p11)  ;;  %v425_v41 = vld [vmem:[%s2236_s22 + $0x70] sm:$0xff] (!%p1068_p11) }
 0x10b   : > { %v1140_v23 = vpack.c.bf16 %v440_v20, %v436_v19  ;;  %v444_v27 = vld [vmem:[%s2236_s22 + $0x108] sm:$0xff]  ;;  %v443_v31 = vld [vmem:[%s2236_s22 + $0x100] sm:$0xff]  ;;  %v1142_v33 = vpack.c.bf16 %v439_v24, %v435_v22  ;;  %v430_v42 = vld [vmem:[%s2236_s22 + $0x98] sm:$0xff]  ;;  %v1166_v45 = vpack.c.bf16 %v425_v41, %v421_v40  ;;  %1165 = vmatprep.subr.bf16.mxu1 %v1164_v39 }
 0x10c   : > { %1135 = vmatpush1.bf16.msra.mxu0 %v1134_v15  ;;  %v448_v28 = vld [vmem:[%s2236_s22 + $0x128] sm:$0xff]  ;;  %v447_v34 = vld [vmem:[%s2236_s22 + $0x120] sm:$0xff]  ;;  %v434_v46 = vld [vmem:[%s2236_s22 + $0xb8] sm:$0xff] }
 0x10d   : > { %1137 = vmatprep.subr.bf16.mxu0 %v1136_v16  ;;  %v1144_v38 = vpack.c.bf16 %v448_v28, %v444_v27  ;;  %v452_v43 = vld [vmem:[%s2236_s22 + $0x148] sm:$0xff]  ;;  %v1168_v47 = vpack.c.bf16 %v434_v46, %v430_v42  ;;  %v429_v48 = vld [vmem:[%s2236_s22 + $0x90] sm:$0xff]  ;;  %v1146_v50 = vpack.c.bf16 %v447_v34, %v443_v31  ;;  %v438_v51 = vld [vmem:[%s2236_s22 + $0xd8] sm:$0xff]  ;;  %1167 = vmatpush1.bf16.msra.mxu1 %v1166_v45 }
 0x10e   : > { %v456_v44 = vld [vmem:[%s2236_s22 + $0x168] sm:$0xff]  ;;  %v433_v49 = vld [vmem:[%s2236_s22 + $0xb0] sm:$0xff]  ;;  %v442_v52 = vld [vmem:[%s2236_s22 + $0xf8] sm:$0xff] }
 0x10f   : > { %v1148_v53 = vpack.c.bf16 %v456_v44, %v452_v43  ;;  %v451_v54 = vld [vmem:[%s2236_s22 + $0x140] sm:$0xff]  ;;  %v460_v56 = vld [vmem:[%s2236_s22 + $0x188] sm:$0xff]  ;;  %v1170_v58 = vpack.c.bf16 %v433_v49, %v429_v48  ;;  %1169 = vmatprep.subr.bf16.mxu1 %v1168_v47  ;;  %v1172_v59 = vpack.c.bf16 %v442_v52, %v438_v51  ;;  %v437_v60 = vld [vmem:[%s2236_s22 + $0xd0] sm:$0xff] }
 0x110   : > { %1139 = vmatpush1.bf16.msra.mxu0 %v1138_v21  ;;  %v455_v55 = vld [vmem:[%s2236_s22 + $0x160] sm:$0xff]  ;;  %v464_v57 = vld [vmem:[%s2236_s22 + $0x1a8] sm:$0xff]  ;;  %v441_v61 = vld [vmem:[%s2236_s22 + $0xf0] sm:$0xff] }
 0x111   : > { %1141 = vmatprep.subr.bf16.mxu0 %v1140_v23  ;;  %v1150_v62 = vpack.c.bf16 %v455_v55, %v451_v54  ;;  %v446_v63 = vld [vmem:[%s2236_s22 + $0x118] sm:$0xff]  ;;  %v1152_v1 = vpack.c.bf16 %v464_v57, %v460_v56  ;;  %v459_v2 = vld [vmem:[%s2236_s22 + $0x180] sm:$0xff]  ;;  %v468_v4 = vld [vmem:[%s2236_s22 + $0x1c8] sm:$0xff]  ;;  %1171 = vmatpush1.bf16.msra.mxu1 %v1170_v58  ;;  %v1174_v6 = vpack.c.bf16 %v441_v61, %v437_v60 }
 0x112   : > { %v450_v0 = vld [vmem:[%s2236_s22 + $0x138] sm:$0xff]  ;;  %v463_v3 = vld [vmem:[%s2236_s22 + $0x1a0] sm:$0xff]  ;;  %v472_v5 = vld [vmem:[%s2236_s22 + $0x1e8] sm:$0xff]  ;;  %1173 = vmatprep.subr.bf16.mxu1 %v1172_v59 }
 0x113   : > { %v1176_v7 = vpack.c.bf16 %v450_v0, %v446_v63  ;;  %v445_v9 = vld [vmem:[%s2236_s22 + $0x110] sm:$0xff]  ;;  %v1154_v11 = vpack.c.bf16 %v463_v3, %v459_v2  ;;  %v454_v12 = vld [vmem:[%s2236_s22 + $0x158] sm:$0xff]  ;;  %v1156_v14 = vpack.c.bf16 %v472_v5, %v468_v4  ;;  %v467_v15 = vld [vmem:[%s2236_s22 + $0x1c0] sm:$0xff] }
 0x114   : > { %1143 = vmatpush1.bf16.msra.mxu0 %v1142_v33  ;;  %v449_v10 = vld [vmem:[%s2236_s22 + $0x130] sm:$0xff]  ;;  %v458_v13 = vld [vmem:[%s2236_s22 + $0x178] sm:$0xff]  ;;  %v471_v16 = vld [vmem:[%s2236_s22 + $0x1e0] sm:$0xff] }
 0x115   : > { %1145 = vmatprep.subr.bf16.mxu0 %v1144_v38  ;;  %1175 = vmatpush1.bf16.msra.mxu1 %v1174_v6  ;;  %v1178_v17 = vpack.c.bf16 %v449_v10, %v445_v9  ;;  %v1180_v18 = vpack.c.bf16 %v458_v13, %v454_v12  ;;  %v453_v19 = vld [vmem:[%s2236_s22 + $0x150] sm:$0xff]  ;;  %v1158_v21 = vpack.c.bf16 %v471_v16, %v467_v15  ;;  %v462_v22 = vld [vmem:[%s2236_s22 + $0x198] sm:$0xff]  ;;  %v407_v28 = vld [vmem:[%s2228_s19] sm:$0xff] }
 0x116   : > { %1177 = vmatprep.subr.bf16.mxu1 %v1176_v7  ;;  %v457_v20 = vld [vmem:[%s2236_s22 + $0x170] sm:$0xff]  ;;  %v466_v23 = vld [vmem:[%s2236_s22 + $0x1b8] sm:$0xff]  ;;  %v408_v35 = vld [vmem:[%s2228_s19 + $0x8] sm:$0xff] }
 0x117   : > { %v1182_v24 = vpack.c.bf16 %v457_v20, %v453_v19  ;;  %v1184_v25 = vpack.c.bf16 %v466_v23, %v462_v22  ;;  %v461_v26 = vld [vmem:[%s2236_s22 + $0x190] sm:$0xff]  ;;  %v470_v29 = vld [vmem:[%s2236_s22 + $0x1d8] sm:$0xff]  ;;  %v737_v39 = vld [vmem:[%s2243_s17 + $0x80] sm:$0xff] }
 0x118   : > { %1147 = vmatpush1.bf16.msra.mxu0 %v1146_v50  ;;  %v465_v27 = vld [vmem:[%s2236_s22 + $0x1b0] sm:$0xff]  ;;  %v474_v30 = vld [vmem:[%s2236_s22 + $0x1f8] sm:$0xff]  ;;  %v738_v40 = vld [vmem:[%s2243_s17 + $0x88] sm:$0xff] }
 0x119   : > { %1149 = vmatprep.subr.bf16.mxu0 %v1148_v53  ;;  %1179 = vmatpush1.bf16.msra.mxu1 %v1178_v17  ;;  %v1186_v31 = vpack.c.bf16 %v465_v27, %v461_v26  ;;  %v1188_v32 = vpack.c.bf16 %v474_v30, %v470_v29  ;;  %v469_v33 = vld [vmem:[%s2236_s22 + $0x1d0] sm:$0xff]  ;;  %v410_v38 = vld [vmem:[%s2228_s19 + $0x18] sm:$0xff]  ;;  %v1192_v41 = vpack.c.bf16 %v738_v40, %v737_v39  ;;  %v721_v42 = vld [vmem:[%s2243_s17] sm:$0xff] }
 0x11a   : > { %1181 = vmatprep.subr.bf16.mxu1 %v1180_v18  ;;  %v473_v34 = vld [vmem:[%s2236_s22 + $0x1f0] sm:$0xff]  ;;  %v722_v43 = vld [vmem:[%s2243_s17 + $0x8] sm:$0xff]  ;;  %v740_v46 = vld [vmem:[%s2243_s17 + $0x98] sm:$0xff] }
 0x11b   : > { %v1190_v36 = vpack.c.bf16 %v473_v34, %v469_v33  ;;  %v409_v37 = vld [vmem:[%s2228_s19 + $0x10] sm:$0xff]  ;;  %v1194_v44 = vpack.c.bf16 %v722_v43, %v721_v42  ;;  %v724_v48 = vld [vmem:[%s2243_s17 + $0x18] sm:$0xff]  ;;  %v741_v50 = vld [vmem:[%s2243_s17 + $0xa0] sm:$0xff] }
 0x11c   : > { %1151 = vmatpush1.bf16.msra.mxu0 %v1150_v62  ;;  %v739_v45 = vld [vmem:[%s2243_s17 + $0x90] sm:$0xff]  ;;  %v742_v51 = vld [vmem:[%s2243_s17 + $0xa8] sm:$0xff]  ;;  %v725_v53 = vld [vmem:[%s2243_s17 + $0x20] sm:$0xff] }
 0x11d   : > { %1153 = vmatprep.subr.bf16.mxu0 %v1152_v1  ;;  %1183 = vmatpush1.bf16.msra.mxu1 %v1182_v24  ;;  %v1196_v47 = vpack.c.bf16 %v740_v46, %v739_v45  ;;  %v1200_v52 = vpack.c.bf16 %v742_v51, %v741_v50  ;;  %v726_v54 = vld [vmem:[%s2243_s17 + $0x28] sm:$0xff]  ;;  %v743_v56 = vld [vmem:[%s2243_s17 + $0xb0] sm:$0xff]  ;;  %v744_v57 = vld [vmem:[%s2243_s17 + $0xb8] sm:$0xff] }
 0x11e   : > { %1185 = vmatprep.subr.bf16.mxu1 %v1184_v25  ;;  %v1202_v55 = vpack.c.bf16 %v726_v54, %v725_v53  ;;  %v1204_v58 = vpack.c.bf16 %v744_v57, %v743_v56  ;;  %v727_v59 = vld [vmem:[%s2243_s17 + $0x30] sm:$0xff]  ;;  %v728_v60 = vld [vmem:[%s2243_s17 + $0x38] sm:$0xff]  ;;  %v745_v62 = vld [vmem:[%s2243_s17 + $0xc0] sm:$0xff] }
 0x11f   : > { %v1206_v61 = vpack.c.bf16 %v728_v60, %v727_v59  ;;  %v746_v63 = vld [vmem:[%s2243_s17 + $0xc8] sm:$0xff]  ;;  %v729_v1 = vld [vmem:[%s2243_s17 + $0x40] sm:$0xff]  ;;  %v747_v4 = vld [vmem:[%s2243_s17 + $0xd0] sm:$0xff] }
 0x120   : > { %1155 = vmatpush1.bf16.msra.mxu0 %v1154_v11  ;;  %v1208_v0 = vpack.c.bf16 %v746_v63, %v745_v62  ;;  %v730_v2 = vld [vmem:[%s2243_s17 + $0x48] sm:$0xff]  ;;  %v748_v5 = vld [vmem:[%s2243_s17 + $0xd8] sm:$0xff]  ;;  %v731_v7 = vld [vmem:[%s2243_s17 + $0x50] sm:$0xff] }
 0x121   : > { %1157 = vmatprep.subr.bf16.mxu0 %v1156_v14  ;;  %1187 = vmatpush1.bf16.msra.mxu1 %v1186_v31  ;;  %v1210_v3 = vpack.c.bf16 %v730_v2, %v729_v1  ;;  %v1212_v6 = vpack.c.bf16 %v748_v5, %v747_v4  ;;  %v732_v9 = vld [vmem:[%s2243_s17 + $0x58] sm:$0xff]  ;;  %v749_v11 = vld [vmem:[%s2243_s17 + $0xe0] sm:$0xff]  ;;  %v750_v12 = vld [vmem:[%s2243_s17 + $0xe8] sm:$0xff] }
 0x122   : > { %1189 = vmatprep.subr.bf16.mxu1 %v1188_v32  ;;  %v1214_v10 = vpack.c.bf16 %v732_v9, %v731_v7  ;;  %v1216_v13 = vpack.c.bf16 %v750_v12, %v749_v11  ;;  %v733_v14 = vld [vmem:[%s2243_s17 + $0x60] sm:$0xff]  ;;  %v734_v15 = vld [vmem:[%s2243_s17 + $0x68] sm:$0xff]  ;;  %v751_v17 = vld [vmem:[%s2243_s17 + $0xf0] sm:$0xff] }
 0x123   : > { %v1218_v16 = vpack.c.bf16 %v734_v15, %v733_v14  ;;  %v752_v18 = vld [vmem:[%s2243_s17 + $0xf8] sm:$0xff]  ;;  %v735_v20 = vld [vmem:[%s2243_s17 + $0x70] sm:$0xff] }
 0x124   : > { %1159 = vmatpush1.bf16.msra.mxu0 %v1158_v21  ;;  %v1220_v19 = vpack.c.bf16 %v752_v18, %v751_v17  ;;  %v736_v21 = vld [vmem:[%s2243_s17 + $0x78] sm:$0xff] }
 0x125   : > { %1191 = vmatpush1.bf16.msra.mxu1 %v1190_v36  ;;  %1193 = vmatprep.subr.bf16.mxu0 %v1192_v41  ;;  %v1222_v22 = vpack.c.bf16 %v736_v21, %v735_v20 }
 0x126   : > { %1224 = vmatprep.subr.bf16.mxu1 %v1192_v41 }
 0x127   : > { %540 = vmatmul.mubr.f32.vlgmr.msra.gmra.mrb[0].mxu0 %v407_v28 }
 0x128   : > { %545 = vmatprep.mubr.f32.mxu0 %v1769_v8  ;;  %629 = vmatmul.mubr.f32.vlgmr.msra.gmra.mrb[0].mxu1 %v407_v28 }
 0x129   : > { %634 = vmatprep.mubr.f32.mxu1 %v1769_v8  ;;  %1195 = vmatpush3.bf16.msra.mxu0 %v1194_v44 }
 0x12a   : > { %1232 = vmatpush3.bf16.msra.mxu1 %v1194_v44  ;;  %1197 = vmatprep.subr.bf16.mxu0 %v1196_v47 }
 0x12b   : > { %546 = vmatmul.mubr.f32.gmra.mrb[2].mxu0 %v408_v35  ;;  %1225 = vmatprep.subr.bf16.mxu1 %v1196_v47 }
 0x12c   : > { %551 = vmatprep.mubr.f32.mxu0 %v1769_v8  ;;  %635 = vmatmul.mubr.f32.gmra.mrb[2].mxu1 %v408_v35 }
 0x12d   : > { %640 = vmatprep.mubr.f32.mxu1 %v1769_v8 }
 0x12f   : > { %552 = vmatmul.mubr.f32.gmra.mrb[4].mxu0 %v409_v37 }
 0x130   : > { %557 = vmatprep.mubr.f32.mxu0 %v1769_v8  ;;  %641 = vmatmul.mubr.f32.gmra.mrb[4].mxu1 %v409_v37 }
 0x131   : > { %646 = vmatprep.mubr.f32.mxu1 %v1769_v8  ;;  %v723_v8 = vld [vmem:[%s2243_s17 + $0x10] sm:$0xff] }
 0x132   : > { %v1198_v49 = vpack.c.bf16 %v724_v48, %v723_v8 }
 0x133   : > { %558 = vmatmul.mubr.f32.gmra.mrb[6].mxu0 %v410_v38 }
 0x134   : > { %647 = vmatmul.mubr.f32.gmra.mrb[6].mxu1 %v410_v38  ;;  %1199 = vmatpush3.bf16.msra.mxu0 %v1198_v49 }
 0x135   : > { %1233 = vmatpush3.bf16.msra.mxu1 %v1198_v49  ;;  %1201 = vmatprep.subr.bf16.mxu0 %v1200_v52 }
 0x136   : > { %1226 = vmatprep.subr.bf16.mxu1 %v1200_v52 }
 0x138   : > { %1203 = vmatpush3.bf16.msra.mxu0 %v1202_v55 }
 0x139   : > { %1234 = vmatpush3.bf16.msra.mxu1 %v1202_v55  ;;  %1205 = vmatprep.subr.bf16.mxu0 %v1204_v58 }
 0x13a   : > { %1227 = vmatprep.subr.bf16.mxu1 %v1204_v58 }
 0x13c   : > { %1207 = vmatpush3.bf16.msra.mxu0 %v1206_v61 }
 0x13d   : > { %1235 = vmatpush3.bf16.msra.mxu1 %v1206_v61  ;;  %1209 = vmatprep.subr.bf16.mxu0 %v1208_v0 }
 0x13e   : > { %1228 = vmatprep.subr.bf16.mxu1 %v1208_v0 }
 0x140   : > { %1211 = vmatpush3.bf16.msra.mxu0 %v1210_v3 }
 0x141   : > { %1236 = vmatpush3.bf16.msra.mxu1 %v1210_v3  ;;  %1213 = vmatprep.subr.bf16.mxu0 %v1212_v6 }
 0x142   : > { %1229 = vmatprep.subr.bf16.mxu1 %v1212_v6 }
 0x144   : > { %1215 = vmatpush3.bf16.msra.mxu0 %v1214_v10 }
 0x145   : > { %1237 = vmatpush3.bf16.msra.mxu1 %v1214_v10  ;;  %1217 = vmatprep.subr.bf16.mxu0 %v1216_v13 }
 0x146   : > { %1230 = vmatprep.subr.bf16.mxu1 %v1216_v13 }
 0x148   : > { %1219 = vmatpush3.bf16.msra.mxu0 %v1218_v16 }
 0x149   : > { %1238 = vmatpush3.bf16.msra.mxu1 %v1218_v16  ;;  %1221 = vmatprep.subr.bf16.mxu0 %v1220_v19 }
 0x14a   : > { %1231 = vmatprep.subr.bf16.mxu1 %v1220_v19 }
 0x14c   : > { %1223 = vmatpush3.bf16.msra.mxu0 %v1222_v22 }
 0x14d   : > { %1239 = vmatpush3.bf16.msra.mxu1 %v1222_v22 }
 0x1fa   : > { %v541_v23 = vpop.f32.mrb[0].mxu0 }
 0x1fb   : > { %v1069_v24 = vmul.f32 -1.442695, %v541_v23  ;;  %v543_v25 = vpop.f32.mrb[1].mxu0  ;;  %v630_v35 = vpop.f32.mrb[0].mxu1 }
 0x1fc   : > { %v1070_v26 = vmul.f32 -1.442695, %v543_v25  ;;  %v632_v36 = vpop.f32.mrb[1].mxu1 }
 0x1fd   : > { %1432 = vpow2.f32 %v1069_v24  ;;  %v717_v24 = vld [vmem:[#allocation2] sm:$0xff] }
 0x1fe   : > { %1434 = vpow2.f32 %v1070_v26  ;;  %v547_v27 = vpop.f32.mrb[2].mxu0 }
 0x1ff   : > { %v1071_v28 = vmul.f32 -1.442695, %v547_v27  ;;  %v549_v29 = vpop.f32.mrb[3].mxu0  ;;  %v636_v44 = vpop.f32.mrb[2].mxu1 }
 0x200   : > { %v1072_v30 = vmul.f32 -1.442695, %v549_v29  ;;  %v638_v46 = vpop.f32.mrb[3].mxu1 }
 0x201   : > { %1436 = vpow2.f32 %v1071_v28 }
 0x202   : > { %1438 = vpow2.f32 %v1072_v30  ;;  %v553_v31 = vpop.f32.mrb[4].mxu0 }
 0x203   : > { %v1073_v32 = vmul.f32 -1.442695, %v553_v31  ;;  %v555_v33 = vpop.f32.mrb[5].mxu0  ;;  %v642_v49 = vpop.f32.mrb[4].mxu1 }
 0x204   : > { %v1074_v34 = vmul.f32 -1.442695, %v555_v33  ;;  %v644_v51 = vpop.f32.mrb[5].mxu1 }
 0x205   : > { %1440 = vpow2.f32 %v1073_v32 }
 0x206   : > { %1442 = vpow2.f32 %v1074_v34  ;;  %v559_v37 = vpop.f32.mrb[6].mxu0  ;;  %v719_v34 = vld [vmem:[#allocation2 + $0x10] sm:$0xff] }
 0x207   : > { %v1433_v38 = vpop.eup %1432  ;;  %v1075_v39 = vmul.f32 -1.442695, %v559_v37  ;;  %v561_v40 = vpop.f32.mrb[7].mxu0 }
 0x208   : > { %v1435_v41 = vpop.eup %1434  ;;  %v677_v42 = vadd.f32 1.0, %v1433_v38  ;;  %v1076_v43 = vmul.f32 -1.442695, %v561_v40  ;;  %v648_v55 = vpop.f32.mrb[6].mxu1 }
 0x209   : > { %v678_v45 = vadd.f32 1.0, %v1435_v41  ;;  %1444 = vpow2.f32 %v1075_v39  ;;  %v650_v57 = vpop.f32.mrb[7].mxu1  ;;  %v720_v39 = vld [vmem:[#allocation2 + $0x18] sm:$0xff] }
 0x20a   : > { %1446 = vrcp.f32 %v677_v42 }
 0x20b   : > { %v1437_v47 = vpop.eup %1436  ;;  %1448 = vrcp.f32 %v678_v45 }
 0x20c   : > { %v1439_v8 = vpop.eup %1438  ;;  %v679_v48 = vadd.f32 1.0, %v1437_v47  ;;  %1450 = vpow2.f32 %v1076_v43 }
 0x20d   : > { %v680_v50 = vadd.f32 1.0, %v1439_v8 }
 0x20e   : > { %1452 = vrcp.f32 %v679_v48 }
 0x20f   : > { %v1441_v52 = vpop.eup %1440  ;;  %1454 = vrcp.f32 %v680_v50 }
 0x210   : > { %v1443_v53 = vpop.eup %1442  ;;  %v681_v54 = vadd.f32 1.0, %v1441_v52 }
 0x211   : > { %v682_v56 = vadd.f32 1.0, %v1443_v53 }
 0x212   : > { %1456 = vrcp.f32 %v681_v54 }
 0x213   : > { %v1445_v58 = vpop.eup %1444  ;;  %1458 = vrcp.f32 %v682_v56 }
 0x214   : > { %v1447_v59 = vpop.eup %1446  ;;  %v683_v60 = vadd.f32 1.0, %v1445_v58 }
 0x215   : > { %v1449_v61 = vpop.eup %1448  ;;  %v701_v62 = vmul.f32 %v1447_v59, %v541_v23 }
 0x216   : > { %v1451_v63 = vpop.eup %1450  ;;  %v702_v0 = vmul.f32 %v1449_v61, %v543_v25  ;;  %1460 = vrcp.f32 %v683_v60 }
 0x217   : > { %v684_v1 = vadd.f32 1.0, %v1451_v63  ;;  %v709_v2 = vmul.f32 %v701_v62, %v630_v35 }
 0x218   : > { %v1453_v3 = vpop.eup %1452  ;;  %v710_v4 = vmul.f32 %v702_v0, %v632_v36 }
 0x219   : > { %v1455_v5 = vpop.eup %1454  ;;  %v703_v6 = vmul.f32 %v1453_v3, %v547_v27  ;;  %1462 = vrcp.f32 %v684_v1 }
 0x21a   : > { %v704_v7 = vmul.f32 %v1455_v5, %v549_v29  ;;  %817 = vmatprep.mubr.f32.mxu0 %v710_v4  ;;  %v718_v29 = vld [vmem:[#allocation2 + $0x8] sm:$0xff] }
 0x21b   : > { %v711_v9 = vmul.f32 %v703_v6, %v636_v44  ;;  %818 = vmatmul.mubr.f32.vlgmr.msra.gmra.mrb[8].mxu0 %v709_v2 }
 0x21c   : > { %v1457_v10 = vpop.eup %1456  ;;  %v712_v11 = vmul.f32 %v704_v7, %v638_v46 }
 0x21d   : > { %v1459_v12 = vpop.eup %1458  ;;  %v705_v13 = vmul.f32 %v1457_v10, %v553_v31 }
 0x21e   : > { %v706_v14 = vmul.f32 %v1459_v12, %v555_v33  ;;  %822 = vmatprep.mubr.f32.mxu0 %v712_v11 }
 0x21f   : > { %v713_v15 = vmul.f32 %v705_v13, %v642_v49  ;;  %823 = vmatmul.mubr.f32.gmra.mrb[10].mxu0 %v711_v9 }
 0x220   : > { %v1461_v16 = vpop.eup %1460  ;;  %v714_v17 = vmul.f32 %v706_v14, %v644_v51 }
 0x221   : > { %v707_v18 = vmul.f32 %v1461_v16, %v559_v37 }
 0x222   : > { %827 = vmatprep.mubr.f32.mxu1 %v714_v17 }
 0x223   : > { %v1463_v19 = vpop.eup %1462  ;;  %v715_v20 = vmul.f32 %v707_v18, %v648_v55  ;;  %828 = vmatmul.mubr.f32.vlgmr.msra.gmra.mrb[8].mxu1 %v713_v15 }
 0x224   : > { %v708_v21 = vmul.f32 %v1463_v19, %v561_v40 }
 0x226   : > { %v716_v22 = vmul.f32 %v708_v21, %v650_v57 }
 0x228   : > { %832 = vmatprep.mubr.f32.mxu1 %v716_v22 }
 0x229   : > { %833 = vmatmul.mubr.f32.gmra.mrb[10].mxu1 %v715_v20 }
 0x2ee   : > { %v1116_v23 = vpop.f32.mrb[8].mxu0 }
 0x2ef   : > { %v1117_v25 = vpop.f32.mrb[9].mxu0 }
 0x2f0   : > { %v1118_v26 = vadd.f32 %v1117_v25, %v1116_v23 }
 0x2f2   : > { %v838_v27 = vadd.f32 %v1118_v26, %v717_v24  ;;  %v1119_v28 = vpop.f32.mrb[10].mxu0 }
 0x2f3   : > { %v1120_v30 = vpop.f32.mrb[11].mxu0 }
 0x2f4   : > { %842 = vst [vmem:[#allocation2] sm:$0xff] %v838_v27  ;;  %v1121_v31 = vadd.f32 %v1120_v30, %v1119_v28 }
 0x2f6   : > { %v839_v32 = vadd.f32 %v1121_v31, %v718_v29  ;;  %v1122_v33 = vpop.f32.mrb[8].mxu1 }
 0x2f7   : > { %v1123_v35 = vpop.f32.mrb[9].mxu1 }
 0x2f8   : > { %843 = vst [vmem:[#allocation2 + $0x8] sm:$0xff] %v839_v32  ;;  %v1124_v36 = vadd.f32 %v1123_v35, %v1122_v33 }
 0x2fa   : > { %v840_v37 = vadd.f32 %v1124_v36, %v719_v34 }
 0x2fc   : > { %844 = vst [vmem:[#allocation2 + $0x10] sm:$0xff] %v840_v37  ;;  %v1125_v38 = vpop.f32.mrb[10].mxu1 }
 0x2fd   : > { %v1126_v40 = vpop.f32.mrb[11].mxu1 }
 0x2fe   : > { %v1127_v41 = vadd.f32 %v1126_v40, %v1125_v38 }
 0x300   : > { %v841_v42 = vadd.f32 %v1127_v41, %v720_v39 }
 0x302   : > { %845 = vst [vmem:[#allocation2 + $0x18] sm:$0xff] %v841_v42 }
 0x303 PF: > { %s2582_s19 = sld [smem:[#allocation34_spill]] }
 0x309   : > { %p846_p5 = scmp.eq.s32.totalorder %s2582_s19, 3 }
 0x30b   : > { %p847_p6 = pnand %p846_p5, %p394_p2 }
 0x30c   : > { %v857_v43 = vld [vmem:[%s2264_s14 + $0x10] sm:$0xff] (!%p847_p6)  ;;  %v855_v44 = vld [vmem:[%s2264_s14] sm:$0xff] (!%p847_p6)  ;;  %v1770_v45 = vmov (!%p847_p6), 0   ;;  %v858_v46 = vld [vmem:[%s2264_s14 + $0x18] sm:$0xff] (!%p847_p6) }
 0x30d   : > { %850 = sbr.rel (%p847_p6) target bundleno = 917 (0x395), region = 60  ;;  %1465 = vset.pattern.permute.xlu1 (!%p847_p6), %v1770_v45  ;;  %1464 = vset.pattern.permute.xlu0 (!%p847_p6), %v1770_v45  ;;  %v856_v47 = vld [vmem:[%s2264_s14 + $0x8] sm:$0xff] (!%p847_p6)  ;;  %v853_v8 = vld [vmem:[#allocation2 + $0x10] sm:$0xff] (!%p847_p6)  ;;  %v851_v48 = vld [vmem:[#allocation2] sm:$0xff] (!%p847_p6) }
 0x30e   : > { %871 = vperm.xlu1 (!%p847_p6), %1465, %v857_v43   ;;  %861 = vperm.xlu0 (!%p847_p6), %1464, %v855_v44   ;;  %v854_v53 = vld [vmem:[#allocation2 + $0x18] sm:$0xff] (!%p847_p6)  ;;  %v852_v54 = vld [vmem:[#allocation2 + $0x8] sm:$0xff] (!%p847_p6) }
 0x312   : > { %876 = vperm.xlu1 (!%p847_p6), %1465, %v858_v46   ;;  %866 = vperm.xlu0 (!%p847_p6), %1464, %v856_v47  }
 0x38d   : > { %v872_v49 = vpop.permute.xlu1 %871  ;;  %v862_v50 = vpop.permute.xlu0 %861 }
 0x38e   : > { %v881_v51 = vmul.f32 %v872_v49, %v853_v8  ;;  %v879_v52 = vmul.f32 %v862_v50, %v851_v48 }
 0x390   : > { %885 = vst [vmem:[%s2266_s10 + $0x10] sm:$0xff] %v881_v51  ;;  %883 = vst [vmem:[%s2266_s10] sm:$0xff] %v879_v52 }
 0x391   : > { %v877_v55 = vpop.permute.xlu1 %876  ;;  %v867_v56 = vpop.permute.xlu0 %866 }
 0x392   : > { %v882_v57 = vmul.f32 %v877_v55, %v854_v53  ;;  %v880_v58 = vmul.f32 %v867_v56, %v852_v54 }
 0x394   : > { %886 = vst [vmem:[%s2266_s10 + $0x18] sm:$0xff] %v882_v57  ;;  %884 = vst [vmem:[%s2266_s10 + $0x8] sm:$0xff] %v880_v58 }
 0x395 PF: > { %s2583_s28 = sld [smem:[#allocation35_spill]]  ;;  %s2585_s22 = sld [smem:[#allocation40_spill]] }
 0x396   : > { %s2586_s17 = sld [smem:[#allocation49_spill]]  ;;  %s901_s27 = sshll.u32 %s2266_s10, 4  ;;  %s2395_s27 = int_to_ptr.vmem [resolvable:$true] %s901_s27 }
 0x397   : > { %s2399_s18 = scalar_lea.sflag [#allocation8], %s368_s15  ;;  %s1576_s21 = scalar_lea.vmem %s2395_s27, 512 }
 0x398   : > { %p1577_p4 = scmp.ne.s32.totalorder %s2395_s27, %s1576_s21  ;;  %s1771_s2 = smov [#allocation12]  }
 0x399   : > { %s1580_s0 = sshll.u32 %s1771_s2, 4  ;;  %s1581_s0 = int_to_ptr.vmem [resolvable:$false] %s1580_s0 }
 0x39a   : > { %s1582_s3 = scalar_lea.vmem %s1581_s0, 1024  ;;  %p1583_p10 = scmp.lt.s32.totalorder %s2395_s27, %s1581_s0 }
 0x39b   : > { %s1083_s12 = sshll.u32 %s2583_s28, 9  ;;  %p2588_p13 = scmp.ne.s32.totalorder %s2585_s22, 0 }
 0x39c   : > { %s2587_s8 = smov %s2586_s17  ;;  %s2392_s13 = scalar_lea.hbm %s2586_s17, %s1083_s12 }
 0x39d   : > { %p1578_p0 = pnand %p1577_p4, %p2588_p13  ;;  %p1584_p3 = scmp.lt.s32.totalorder %s1582_s3, %s1576_s21 }
 0x39f   : > { %p1579_p7 = pneg %p1578_p0  ;;  %p1585_p1 = por %p1584_p3, %p1583_p10 }
 0x3a1   : > { %p1586_p8 = pnand %p1585_p1, %p1579_p7 }
 0x3a3   : > { %1589 = shalt.err (!%p1586_p8)
}
 0x3a4   : > { %s1590_s15 = scalar_lea.hbm %s2392_s13, 512  ;;  %s1594_s6 = scalar_lea.hbm %s2587_s8, 4608 }
 0x3a5   : > { %p1591_p2 = scmp.ne.s32.totalorder %s2392_s13, %s1590_s15  ;;  %p1595_p11 = scmp.lt.u32.totalorder %s2392_s13, %s2587_s8 }
 0x3a6   : > { %p1596_p5 = scmp.lt.u32.totalorder %s1594_s6, %s1590_s15  ;;  %p1598_p4 = scmp.lt.u32.totalorder %s1590_s15, %s2392_s13 }
 0x3a7   : > { %p1592_p12 = pnand %p1591_p2, %p2588_p13 }
 0x3a8   : > { %p1597_p6 = por %p1596_p5, %p1595_p11 }
 0x3a9   : > { %p1593_p9 = pneg %p1592_p12 }
 0x3aa   : > { %p1599_p0 = por %p1598_p4, %p1597_p6 }
 0x3ac   : > { %p1600_p7 = pnand %p1599_p0, %p1593_p9 }
 0x3ae   : > { %1603 = shalt.err (!%p1600_p7)
}
 0x3af   : > { %s1772_s10 = smov 128   ;;  %s1773_s19 = smov 8  }
 0x3b0   : > { %1256 = dma.vmem_to_hbm [thread:$0]  (%p2588_p13), %s2395_s27, 512, %s2392_s13, %s2399_s18, %s1772_s10, %s1772_s10, %s1773_s19  }
 0x3b1 PF: > { %s2589_s28 = sld [smem:[#allocation28_spill]]  ;;  %s2590_s23 = sld [smem:[#allocation41_spill]] }
 0x3b2   : > { %p1283_p10 = scmp.ge.s32.totalorder %s1756_s7, 2 }
 0x3b7   : > { %s916_s12 = sand.u32 1, %s2589_s28   ;;  %p2591_p3 = scmp.ne.s32.totalorder %s2590_s23, 0 }
 0x3b8   : > { %s917_s9 = scalar_lea.sflag [#allocation8], %s916_s12 }
 0x3b9   : > { %p1279_p1 = pnand %p1283_p10, %p2591_p3 }
 0x3bb   : > { %1687 = dma.done.wait (!%p1279_p1), %s917_s9, 512  }
 0x3bc   : > { %1689 = vsyncadd (!%p1279_p1), %s917_s9, 4294966784  ;;  %s31_s7 = sadd.s32 1, %s1756_s7   ;;  %s2593_s0 = sld [smem:[#allocation29_spill]] }
 0x3bd   : > { %p2428_p8 = scmp.ge.s32.totalorder %s31_s7, 38   ;;  %s2594_s17 = sld [smem:[#allocation30_spill]] }
 0x3be   : > { %s2595_s18 = sld [smem:[#allocation39_spill]]  ;;  %s2596_s21 = sld [smem:[#allocation31_spill]] }
 0x3bf   : > { %s2597_s22 = sld [smem:[#allocation32_spill]]  ;;  %s2598_s23 = sld [smem:[#allocation42_spill]] }
 0x3c0   : > { %s2599_s13 = sld [smem:[#allocation33_spill]]  ;;  %s2600_s26 = sld [smem:[#allocation43_spill]] }
 0x3c1   : > { %s2601_s2 = sld [smem:[#allocation36_spill]]  ;;  %s2602_s3 = sld [smem:[#allocation37_spill]] }
 0x3c2   : > { %s2603_s19 = smov %s1708_s20  ;;  %s2604_s20 = smov %s1712_s1 }
 0x3c3   : > { %s2605_s1 = smov %s2175_s4  ;;  %s2606_s24 = smov %s1732_s25 }
 0x3c4   : > { %s2608_s27 = smov %s1748_s29  ;;  %s2609_s28 = smov %s1752_s30 }
 0x3c5   :  { %30 = sbr.rel (!%p2428_p8) target bundleno = 34 (0x22), region = 120 }
 0x3c6   : > { %s2607_s25 = smov %s2599_s13 }
 0x3c7   : > { %s2610_s29 = smov %s2601_s2  ;;  %s2611_s30 = smov %s2602_s3 }
 0x3cc   :  { %922 = vsyncpa [#allocation7], 1 }
 0x3cd   :  { %924 = vsyncpa [#allocation7 + $0x1], 1 }
 0x3ce   :  { %925 = vsyncpa [#allocation10], 1 }
 0x3cf   :  { %927 = vsyncpa [#allocation10 + $0x1], 1 }
 0x3d0   :  { %928 = vsyncpa [#allocation8], 1 }
 0x3d1   :  { %930 = vsyncpa [#allocation8 + $0x1], 1 }

</bundles_post_ra>
